<compile_context>
chip_gen: v7x
topology: tpu7x:2x2x1
jax: 0.10.0
libtpu: 0.0.40
codegen_flags: <defaults>
</compile_context>

<pallas_src>
import jax
import jax.numpy as jnp
from jax import lax
from jax.experimental import pallas as pl
from jax.experimental.pallas import tpu as pltpu


def _round_up(x, m):
    return ((x + m - 1) // m) * m


def _pad2(a, rows, cols):
    return jnp.pad(a, ((0, rows - a.shape[0]), (0, cols - a.shape[1])))


def rnn_head_kernel(tok_ref, table_ref, whh_ref, wout_ref, bout_ref, o_ref):
    """Embedding-gather + RNN recurrence + linear head (operands pre-padded).

    tok_ref   : SMEM (B_pad, T) int32   token ids (padded rows use token 0)
    table_ref : VMEM (V, 1, H_pad) f32  fused per-token emb@W_ih^T + bias
    whh_ref   : VMEM (H_pad, H_pad) bf16 hidden->hidden weights (transposed)
    wout_ref  : VMEM (H_pad, C_pad) bf16 output weights (transposed)
    bout_ref  : VMEM (1, C_pad) f32      output bias
    o_ref     : VMEM (B_pad, C_pad) f32  lane-dense padded logits
    """
    B_pad, T = tok_ref.shape

    # ---- In-kernel gather (off the serial critical path) -------------------
    # For each (b, t): one dynamic leading-dim row load of the fused table.
    # Each xw_t is one (B_pad, H_pad) vreg held in registers across the loop.
    xw = []
    for t in range(T):
        rows = [table_ref[tok_ref[b, t]] for b in range(B_pad)]  # each (1, H_pad)
        xw.append(jnp.concatenate(rows, axis=0))                 # (B_pad, H_pad) f32

    # Hoist the recurrent weights out of the loop (bf16 -> half the vregs).
    whh = whh_ref[...]
    # TODO(synk): verify in the bundle dump that Mosaic keeps W_hh
    # weight-stationary across the 8 unrolled dots; if it re-pushes the RHS
    # per step, drive the MXU explicitly with pltpu.matmul_push_rhs /
    # matmul_acc_lhs / matmul_pop.

    # ---- Serial recurrence: only h @ W_hh remains on the critical path -----
    h = jnp.zeros((B_pad, whh.shape[1]), jnp.float32)
    for t in range(T):  # T tiny & static -> fully unrolled, one basic block
        h = jnp.tanh(
            xw[t]
            + jnp.dot(h.astype(jnp.bfloat16), whh,
                      preferred_element_type=jnp.float32)
        )

    # ---- Head: lane-dense (B_pad, 128) store; wrapper slices to (B, 3) -----
    o_ref[...] = (
        jnp.dot(h.astype(jnp.bfloat16), wout_ref[...],
                preferred_element_type=jnp.float32)
        + bout_ref[...]
    )


def init_params(key, vocab_size, emb_dim, hidden_size, num_classes=3):
    ks = jax.random.split(key, 6)
    scale = 0.1
    return {
        "emb":     scale * jax.random.normal(ks[0], (vocab_size, emb_dim), jnp.float32),
        "w_ih_t":  scale * jax.random.normal(ks[1], (emb_dim, hidden_size), jnp.float32),
        "w_hh_t":  scale * jax.random.normal(ks[2], (hidden_size, hidden_size), jnp.float32),
        # combined b_ih + b_hh of nn.RNN, kept 2-D for clean VMEM layout
        "b":       scale * jax.random.normal(ks[3], (1, hidden_size), jnp.float32),
        "w_out_t": scale * jax.random.normal(ks[4], (hidden_size, num_classes), jnp.float32),
        "b_out":   scale * jax.random.normal(ks[5], (1, num_classes), jnp.float32),
    }


def prepare_params(params):
    """One-time (model-load) precompute: fused table, padding, dtype casts.

    Removes the per-call table matmul / pad / cast XLA ops from the forward
    path (the forward is dispatch/latency bound at these shapes).
    """
    H = params["w_hh_t"].shape[0]
    C = params["w_out_t"].shape[1]
    H_pad = _round_up(H, 128)   # lane width
    C_pad = _round_up(C, 128)   # lane-dense output store

    # Fuse embedding lookup + input projection + RNN bias into one table:
    #   table[v] = emb[v] @ W_ih^T + (b_ih + b_hh)            (V, H)
    # HIGHEST precision: it runs once and keeps parity with the f32 reference.
    table = (
        jnp.dot(params["emb"], params["w_ih_t"],
                precision=lax.Precision.HIGHEST)
        + params["b"]
    )
    table = jnp.pad(table, ((0, 0), (0, H_pad - H)))           # (V, H_pad)
    table = table[:, None, :].astype(jnp.float32)              # (V, 1, H_pad)

    return {
        "table": table,
        "whh":   _pad2(params["w_hh_t"], H_pad, H_pad).astype(jnp.bfloat16),
        "wout":  _pad2(params["w_out_t"], H_pad, C_pad).astype(jnp.bfloat16),
        "bout":  _pad2(params["b_out"], 1, C_pad).astype(jnp.float32),
    }


def rnn_model_forward(x_tokens, prepared, *, num_classes=3):
    """x_tokens: int32 (B, T) token ids. Returns logits (B, num_classes) f32."""
    B, T = x_tokens.shape
    C_pad = prepared["wout"].shape[1]
    B_pad = _round_up(max(B, 8), 8)   # sublane multiple

    # Pad batch with token 0 ('unk'); the only per-call host-side op.
    tok = jnp.zeros((B_pad, T), jnp.int32).at[:B].set(x_tokens.astype(jnp.int32))

    # TODO(synk): if B grows, add a batch grid axis with
    # dimension_semantics=("parallel",) so v7x's two TensorCores each take half
    # the batch, and re-derive any xw/T blocking against 64 MiB VMEM (v7x)
    # rather than 128 MiB (v5e/v6e). Unnecessary at these toy shapes.
    out_p = pl.pallas_call(
        rnn_head_kernel,
        out_shape=jax.ShapeDtypeStruct((B_pad, C_pad), jnp.float32),
        in_specs=[
            pl.BlockSpec(memory_space=pltpu.MemorySpace.SMEM),   # tok
            pl.BlockSpec(memory_space=pltpu.MemorySpace.VMEM),   # table
            pl.BlockSpec(memory_space=pltpu.MemorySpace.VMEM),   # whh
            pl.BlockSpec(memory_space=pltpu.MemorySpace.VMEM),   # wout
            pl.BlockSpec(memory_space=pltpu.MemorySpace.VMEM),   # bout
        ],
        out_specs=pl.BlockSpec(memory_space=pltpu.MemorySpace.VMEM),
    )(tok, prepared["table"], prepared["whh"], prepared["wout"], prepared["bout"])

    return out_p[:B, :num_classes]


def rnn_model_forward_ref(x_tokens, params):
    """Pure-JAX f32 reference matching the PyTorch semantics."""
    emb = params["emb"][x_tokens]                     # (B, T, E)
    B = x_tokens.shape[0]
    H = params["w_hh_t"].shape[0]

    def step(h, x_t):
        h_new = jnp.tanh(x_t @ params["w_ih_t"] + h @ params["w_hh_t"] + params["b"])
        return h_new, None

    h0 = jnp.zeros((B, H), jnp.float32)
    h_final, _ = lax.scan(step, h0, jnp.transpose(emb, (1, 0, 2)))
    return h_final @ params["w_out_t"] + params["b_out"]


if __name__ == "__main__":
    key = jax.random.PRNGKey(0)
    k_param, k_tok = jax.random.split(key)

    vocab_size = 30     # len(data_vocab) for a small synthetic vocab
    emb_dim = 32
    hidden_size = 32
    B, T = 2, 8

    params = init_params(k_param, vocab_size, emb_dim, hidden_size)
    prepared = prepare_params(params)   # one-time, model-load precompute
    x_tokens = jax.random.randint(k_tok, (B, T), 0, vocab_size, dtype=jnp.int32)

    forward = jax.jit(rnn_model_forward, static_argnames=("num_classes",))
    logits = forward(x_tokens, prepared, num_classes=3)
    logits = jax.block_until_ready(logits)

    ref = rnn_model_forward_ref(x_tokens, params)
    assert logits.shape == (B, 3)
    # Tolerance loosened vs the f32 reference: the recurrence/head matmuls now
    # use bf16 MXU inputs (f32 accumulate), compounding over T=8 serial steps.
    assert jnp.allclose(logits, ref, atol=2e-2, rtol=2e-2), "mismatch vs reference"

    # TODO(synk): training path (cross_entropy loss when y is given) is not
    # implemented in-kernel; forward returns logits as the y=None branch does.
    print("KERNEL_OK")
</pallas_src>

<mosaic_0001>
module attributes {stable_mosaic.version = 11 : i64} {
  func.func @rnn_head_kernel(%arg0: memref<8x8xi32, #tpu.memory_space<smem>>, %arg1: memref<30x1x128xf32, #tpu.memory_space<vmem>>, %arg2: memref<128x128xbf16, #tpu.memory_space<vmem>>, %arg3: memref<128x128xbf16, #tpu.memory_space<vmem>>, %arg4: memref<1x128xf32, #tpu.memory_space<vmem>>, %arg5: memref<8x128xf32, #tpu.memory_space<vmem>>) attributes {dimension_semantics = [], scalar_prefetch = 0 : i64, scratch_operands = 0 : i64, tpu.core_type = #tpu.core_type<tc>} {
    %c0 = arith.constant 0 : index
    %c0_0 = arith.constant 0 : index
    %0 = memref.load %arg0[%c0, %c0_0] : memref<8x8xi32, #tpu.memory_space<smem>>
    %1 = arith.index_cast %0 : i32 to index
    %c0_1 = arith.constant 0 : index
    %c0_2 = arith.constant 0 : index
    %2 = vector.load %arg1[%1, %c0_1, %c0_2] : memref<30x1x128xf32, #tpu.memory_space<vmem>>, vector<1x1x128xf32>
    %3 = vector.shape_cast %2 : vector<1x1x128xf32> to vector<1x128xf32>
    %c1 = arith.constant 1 : index
    %c0_3 = arith.constant 0 : index
    %4 = memref.load %arg0[%c1, %c0_3] : memref<8x8xi32, #tpu.memory_space<smem>>
    %5 = arith.index_cast %4 : i32 to index
    %c0_4 = arith.constant 0 : index
    %c0_5 = arith.constant 0 : index
    %6 = vector.load %arg1[%5, %c0_4, %c0_5] : memref<30x1x128xf32, #tpu.memory_space<vmem>>, vector<1x1x128xf32>
    %7 = vector.shape_cast %6 : vector<1x1x128xf32> to vector<1x128xf32>
    %c2 = arith.constant 2 : index
    %c0_6 = arith.constant 0 : index
    %8 = memref.load %arg0[%c2, %c0_6] : memref<8x8xi32, #tpu.memory_space<smem>>
    %9 = arith.index_cast %8 : i32 to index
    %c0_7 = arith.constant 0 : index
    %c0_8 = arith.constant 0 : index
    %10 = vector.load %arg1[%9, %c0_7, %c0_8] : memref<30x1x128xf32, #tpu.memory_space<vmem>>, vector<1x1x128xf32>
    %11 = vector.shape_cast %10 : vector<1x1x128xf32> to vector<1x128xf32>
    %c3 = arith.constant 3 : index
    %c0_9 = arith.constant 0 : index
    %12 = memref.load %arg0[%c3, %c0_9] : memref<8x8xi32, #tpu.memory_space<smem>>
    %13 = arith.index_cast %12 : i32 to index
    %c0_10 = arith.constant 0 : index
    %c0_11 = arith.constant 0 : index
    %14 = vector.load %arg1[%13, %c0_10, %c0_11] : memref<30x1x128xf32, #tpu.memory_space<vmem>>, vector<1x1x128xf32>
    %15 = vector.shape_cast %14 : vector<1x1x128xf32> to vector<1x128xf32>
    %c4 = arith.constant 4 : index
    %c0_12 = arith.constant 0 : index
    %16 = memref.load %arg0[%c4, %c0_12] : memref<8x8xi32, #tpu.memory_space<smem>>
    %17 = arith.index_cast %16 : i32 to index
    %c0_13 = arith.constant 0 : index
    %c0_14 = arith.constant 0 : index
    %18 = vector.load %arg1[%17, %c0_13, %c0_14] : memref<30x1x128xf32, #tpu.memory_space<vmem>>, vector<1x1x128xf32>
    %19 = vector.shape_cast %18 : vector<1x1x128xf32> to vector<1x128xf32>
    %c5 = arith.constant 5 : index
    %c0_15 = arith.constant 0 : index
    %20 = memref.load %arg0[%c5, %c0_15] : memref<8x8xi32, #tpu.memory_space<smem>>
    %21 = arith.index_cast %20 : i32 to index
    %c0_16 = arith.constant 0 : index
    %c0_17 = arith.constant 0 : index
    %22 = vector.load %arg1[%21, %c0_16, %c0_17] : memref<30x1x128xf32, #tpu.memory_space<vmem>>, vector<1x1x128xf32>
    %23 = vector.shape_cast %22 : vector<1x1x128xf32> to vector<1x128xf32>
    %c6 = arith.constant 6 : index
    %c0_18 = arith.constant 0 : index
    %24 = memref.load %arg0[%c6, %c0_18] : memref<8x8xi32, #tpu.memory_space<smem>>
    %25 = arith.index_cast %24 : i32 to index
    %c0_19 = arith.constant 0 : index
    %c0_20 = arith.constant 0 : index
    %26 = vector.load %arg1[%25, %c0_19, %c0_20] : memref<30x1x128xf32, #tpu.memory_space<vmem>>, vector<1x1x128xf32>
    %27 = vector.shape_cast %26 : vector<1x1x128xf32> to vector<1x128xf32>
    %c7 = arith.constant 7 : index
    %c0_21 = arith.constant 0 : index
    %28 = memref.load %arg0[%c7, %c0_21] : memref<8x8xi32, #tpu.memory_space<smem>>
    %29 = arith.index_cast %28 : i32 to index
    %c0_22 = arith.constant 0 : index
    %c0_23 = arith.constant 0 : index
    %30 = vector.load %arg1[%29, %c0_22, %c0_23] : memref<30x1x128xf32, #tpu.memory_space<vmem>>, vector<1x1x128xf32>
    %31 = vector.shape_cast %30 : vector<1x1x128xf32> to vector<1x128xf32>
    %32 = tpu.concatenate %3, %7, %11, %15, %19, %23, %27, %31 in 0 : vector<1x128xf32>, vector<1x128xf32>, vector<1x128xf32>, vector<1x128xf32>, vector<1x128xf32>, vector<1x128xf32>, vector<1x128xf32>, vector<1x128xf32> -> vector<8x128xf32>
    %c0_24 = arith.constant 0 : index
    %c1_25 = arith.constant 1 : index
    %33 = memref.load %arg0[%c0_24, %c1_25] : memref<8x8xi32, #tpu.memory_space<smem>>
    %34 = arith.index_cast %33 : i32 to index
    %c0_26 = arith.constant 0 : index
    %c0_27 = arith.constant 0 : index
    %35 = vector.load %arg1[%34, %c0_26, %c0_27] : memref<30x1x128xf32, #tpu.memory_space<vmem>>, vector<1x1x128xf32>
    %36 = vector.shape_cast %35 : vector<1x1x128xf32> to vector<1x128xf32>
    %c1_28 = arith.constant 1 : index
    %c1_29 = arith.constant 1 : index
    %37 = memref.load %arg0[%c1_28, %c1_29] : memref<8x8xi32, #tpu.memory_space<smem>>
    %38 = arith.index_cast %37 : i32 to index
    %c0_30 = arith.constant 0 : index
    %c0_31 = arith.constant 0 : index
    %39 = vector.load %arg1[%38, %c0_30, %c0_31] : memref<30x1x128xf32, #tpu.memory_space<vmem>>, vector<1x1x128xf32>
    %40 = vector.shape_cast %39 : vector<1x1x128xf32> to vector<1x128xf32>
    %c2_32 = arith.constant 2 : index
    %c1_33 = arith.constant 1 : index
    %41 = memref.load %arg0[%c2_32, %c1_33] : memref<8x8xi32, #tpu.memory_space<smem>>
    %42 = arith.index_cast %41 : i32 to index
    %c0_34 = arith.constant 0 : index
    %c0_35 = arith.constant 0 : index
    %43 = vector.load %arg1[%42, %c0_34, %c0_35] : memref<30x1x128xf32, #tpu.memory_space<vmem>>, vector<1x1x128xf32>
    %44 = vector.shape_cast %43 : vector<1x1x128xf32> to vector<1x128xf32>
    %c3_36 = arith.constant 3 : index
    %c1_37 = arith.constant 1 : index
    %45 = memref.load %arg0[%c3_36, %c1_37] : memref<8x8xi32, #tpu.memory_space<smem>>
    %46 = arith.index_cast %45 : i32 to index
    %c0_38 = arith.constant 0 : index
    %c0_39 = arith.constant 0 : index
    %47 = vector.load %arg1[%46, %c0_38, %c0_39] : memref<30x1x128xf32, #tpu.memory_space<vmem>>, vector<1x1x128xf32>
    %48 = vector.shape_cast %47 : vector<1x1x128xf32> to vector<1x128xf32>
    %c4_40 = arith.constant 4 : index
    %c1_41 = arith.constant 1 : index
    %49 = memref.load %arg0[%c4_40, %c1_41] : memref<8x8xi32, #tpu.memory_space<smem>>
    %50 = arith.index_cast %49 : i32 to index
    %c0_42 = arith.constant 0 : index
    %c0_43 = arith.constant 0 : index
    %51 = vector.load %arg1[%50, %c0_42, %c0_43] : memref<30x1x128xf32, #tpu.memory_space<vmem>>, vector<1x1x128xf32>
    %52 = vector.shape_cast %51 : vector<1x1x128xf32> to vector<1x128xf32>
    %c5_44 = arith.constant 5 : index
    %c1_45 = arith.constant 1 : index
    %53 = memref.load %arg0[%c5_44, %c1_45] : memref<8x8xi32, #tpu.memory_space<smem>>
    %54 = arith.index_cast %53 : i32 to index
    %c0_46 = arith.constant 0 : index
    %c0_47 = arith.constant 0 : index
    %55 = vector.load %arg1[%54, %c0_46, %c0_47] : memref<30x1x128xf32, #tpu.memory_space<vmem>>, vector<1x1x128xf32>
    %56 = vector.shape_cast %55 : vector<1x1x128xf32> to vector<1x128xf32>
    %c6_48 = arith.constant 6 : index
    %c1_49 = arith.constant 1 : index
    %57 = memref.load %arg0[%c6_48, %c1_49] : memref<8x8xi32, #tpu.memory_space<smem>>
    %58 = arith.index_cast %57 : i32 to index
    %c0_50 = arith.constant 0 : index
    %c0_51 = arith.constant 0 : index
    %59 = vector.load %arg1[%58, %c0_50, %c0_51] : memref<30x1x128xf32, #tpu.memory_space<vmem>>, vector<1x1x128xf32>
    %60 = vector.shape_cast %59 : vector<1x1x128xf32> to vector<1x128xf32>
    %c7_52 = arith.constant 7 : index
    %c1_53 = arith.constant 1 : index
    %61 = memref.load %arg0[%c7_52, %c1_53] : memref<8x8xi32, #tpu.memory_space<smem>>
    %62 = arith.index_cast %61 : i32 to index
    %c0_54 = arith.constant 0 : index
    %c0_55 = arith.constant 0 : index
    %63 = vector.load %arg1[%62, %c0_54, %c0_55] : memref<30x1x128xf32, #tpu.memory_space<vmem>>, vector<1x1x128xf32>
    %64 = vector.shape_cast %63 : vector<1x1x128xf32> to vector<1x128xf32>
    %65 = tpu.concatenate %36, %40, %44, %48, %52, %56, %60, %64 in 0 : vector<1x128xf32>, vector<1x128xf32>, vector<1x128xf32>, vector<1x128xf32>, vector<1x128xf32>, vector<1x128xf32>, vector<1x128xf32>, vector<1x128xf32> -> vector<8x128xf32>
    %c0_56 = arith.constant 0 : index
    %c2_57 = arith.constant 2 : index
    %66 = memref.load %arg0[%c0_56, %c2_57] : memref<8x8xi32, #tpu.memory_space<smem>>
    %67 = arith.index_cast %66 : i32 to index
    %c0_58 = arith.constant 0 : index
    %c0_59 = arith.constant 0 : index
    %68 = vector.load %arg1[%67, %c0_58, %c0_59] : memref<30x1x128xf32, #tpu.memory_space<vmem>>, vector<1x1x128xf32>
    %69 = vector.shape_cast %68 : vector<1x1x128xf32> to vector<1x128xf32>
    %c1_60 = arith.constant 1 : index
    %c2_61 = arith.constant 2 : index
    %70 = memref.load %arg0[%c1_60, %c2_61] : memref<8x8xi32, #tpu.memory_space<smem>>
    %71 = arith.index_cast %70 : i32 to index
    %c0_62 = arith.constant 0 : index
    %c0_63 = arith.constant 0 : index
    %72 = vector.load %arg1[%71, %c0_62, %c0_63] : memref<30x1x128xf32, #tpu.memory_space<vmem>>, vector<1x1x128xf32>
    %73 = vector.shape_cast %72 : vector<1x1x128xf32> to vector<1x128xf32>
    %c2_64 = arith.constant 2 : index
    %c2_65 = arith.constant 2 : index
    %74 = memref.load %arg0[%c2_64, %c2_65] : memref<8x8xi32, #tpu.memory_space<smem>>
    %75 = arith.index_cast %74 : i32 to index
    %c0_66 = arith.constant 0 : index
    %c0_67 = arith.constant 0 : index
    %76 = vector.load %arg1[%75, %c0_66, %c0_67] : memref<30x1x128xf32, #tpu.memory_space<vmem>>, vector<1x1x128xf32>
    %77 = vector.shape_cast %76 : vector<1x1x128xf32> to vector<1x128xf32>
    %c3_68 = arith.constant 3 : index
    %c2_69 = arith.constant 2 : index
    %78 = memref.load %arg0[%c3_68, %c2_69] : memref<8x8xi32, #tpu.memory_space<smem>>
    %79 = arith.index_cast %78 : i32 to index
    %c0_70 = arith.constant 0 : index
    %c0_71 = arith.constant 0 : index
    %80 = vector.load %arg1[%79, %c0_70, %c0_71] : memref<30x1x128xf32, #tpu.memory_space<vmem>>, vector<1x1x128xf32>
    %81 = vector.shape_cast %80 : vector<1x1x128xf32> to vector<1x128xf32>
    %c4_72 = arith.constant 4 : index
    %c2_73 = arith.constant 2 : index
    %82 = memref.load %arg0[%c4_72, %c2_73] : memref<8x8xi32, #tpu.memory_space<smem>>
    %83 = arith.index_cast %82 : i32 to index
    %c0_74 = arith.constant 0 : index
    %c0_75 = arith.constant 0 : index
    %84 = vector.load %arg1[%83, %c0_74, %c0_75] : memref<30x1x128xf32, #tpu.memory_space<vmem>>, vector<1x1x128xf32>
    %85 = vector.shape_cast %84 : vector<1x1x128xf32> to vector<1x128xf32>
    %c5_76 = arith.constant 5 : index
    %c2_77 = arith.constant 2 : index
    %86 = memref.load %arg0[%c5_76, %c2_77] : memref<8x8xi32, #tpu.memory_space<smem>>
    %87 = arith.index_cast %86 : i32 to index
    %c0_78 = arith.constant 0 : index
    %c0_79 = arith.constant 0 : index
    %88 = vector.load %arg1[%87, %c0_78, %c0_79] : memref<30x1x128xf32, #tpu.memory_space<vmem>>, vector<1x1x128xf32>
    %89 = vector.shape_cast %88 : vector<1x1x128xf32> to vector<1x128xf32>
    %c6_80 = arith.constant 6 : index
    %c2_81 = arith.constant 2 : index
    %90 = memref.load %arg0[%c6_80, %c2_81] : memref<8x8xi32, #tpu.memory_space<smem>>
    %91 = arith.index_cast %90 : i32 to index
    %c0_82 = arith.constant 0 : index
    %c0_83 = arith.constant 0 : index
    %92 = vector.load %arg1[%91, %c0_82, %c0_83] : memref<30x1x128xf32, #tpu.memory_space<vmem>>, vector<1x1x128xf32>
    %93 = vector.shape_cast %92 : vector<1x1x128xf32> to vector<1x128xf32>
    %c7_84 = arith.constant 7 : index
    %c2_85 = arith.constant 2 : index
    %94 = memref.load %arg0[%c7_84, %c2_85] : memref<8x8xi32, #tpu.memory_space<smem>>
    %95 = arith.index_cast %94 : i32 to index
    %c0_86 = arith.constant 0 : index
    %c0_87 = arith.constant 0 : index
    %96 = vector.load %arg1[%95, %c0_86, %c0_87] : memref<30x1x128xf32, #tpu.memory_space<vmem>>, vector<1x1x128xf32>
    %97 = vector.shape_cast %96 : vector<1x1x128xf32> to vector<1x128xf32>
    %98 = tpu.concatenate %69, %73, %77, %81, %85, %89, %93, %97 in 0 : vector<1x128xf32>, vector<1x128xf32>, vector<1x128xf32>, vector<1x128xf32>, vector<1x128xf32>, vector<1x128xf32>, vector<1x128xf32>, vector<1x128xf32> -> vector<8x128xf32>
    %c0_88 = arith.constant 0 : index
    %c3_89 = arith.constant 3 : index
    %99 = memref.load %arg0[%c0_88, %c3_89] : memref<8x8xi32, #tpu.memory_space<smem>>
    %100 = arith.index_cast %99 : i32 to index
    %c0_90 = arith.constant 0 : index
    %c0_91 = arith.constant 0 : index
    %101 = vector.load %arg1[%100, %c0_90, %c0_91] : memref<30x1x128xf32, #tpu.memory_space<vmem>>, vector<1x1x128xf32>
    %102 = vector.shape_cast %101 : vector<1x1x128xf32> to vector<1x128xf32>
    %c1_92 = arith.constant 1 : index
    %c3_93 = arith.constant 3 : index
    %103 = memref.load %arg0[%c1_92, %c3_93] : memref<8x8xi32, #tpu.memory_space<smem>>
    %104 = arith.index_cast %103 : i32 to index
    %c0_94 = arith.constant 0 : index
    %c0_95 = arith.constant 0 : index
    %105 = vector.load %arg1[%104, %c0_94, %c0_95] : memref<30x1x128xf32, #tpu.memory_space<vmem>>, vector<1x1x128xf32>
    %106 = vector.shape_cast %105 : vector<1x1x128xf32> to vector<1x128xf32>
    %c2_96 = arith.constant 2 : index
    %c3_97 = arith.constant 3 : index
    %107 = memref.load %arg0[%c2_96, %c3_97] : memref<8x8xi32, #tpu.memory_space<smem>>
    %108 = arith.index_cast %107 : i32 to index
    %c0_98 = arith.constant 0 : index
    %c0_99 = arith.constant 0 : index
    %109 = vector.load %arg1[%108, %c0_98, %c0_99] : memref<30x1x128xf32, #tpu.memory_space<vmem>>, vector<1x1x128xf32>
    %110 = vector.shape_cast %109 : vector<1x1x128xf32> to vector<1x128xf32>
    %c3_100 = arith.constant 3 : index
    %c3_101 = arith.constant 3 : index
    %111 = memref.load %arg0[%c3_100, %c3_101] : memref<8x8xi32, #tpu.memory_space<smem>>
    %112 = arith.index_cast %111 : i32 to index
    %c0_102 = arith.constant 0 : index
    %c0_103 = arith.constant 0 : index
    %113 = vector.load %arg1[%112, %c0_102, %c0_103] : memref<30x1x128xf32, #tpu.memory_space<vmem>>, vector<1x1x128xf32>
    %114 = vector.shape_cast %113 : vector<1x1x128xf32> to vector<1x128xf32>
    %c4_104 = arith.constant 4 : index
    %c3_105 = arith.constant 3 : index
    %115 = memref.load %arg0[%c4_104, %c3_105] : memref<8x8xi32, #tpu.memory_space<smem>>
    %116 = arith.index_cast %115 : i32 to index
    %c0_106 = arith.constant 0 : index
    %c0_107 = arith.constant 0 : index
    %117 = vector.load %arg1[%116, %c0_106, %c0_107] : memref<30x1x128xf32, #tpu.memory_space<vmem>>, vector<1x1x128xf32>
    %118 = vector.shape_cast %117 : vector<1x1x128xf32> to vector<1x128xf32>
    %c5_108 = arith.constant 5 : index
    %c3_109 = arith.constant 3 : index
    %119 = memref.load %arg0[%c5_108, %c3_109] : memref<8x8xi32, #tpu.memory_space<smem>>
    %120 = arith.index_cast %119 : i32 to index
    %c0_110 = arith.constant 0 : index
    %c0_111 = arith.constant 0 : index
    %121 = vector.load %arg1[%120, %c0_110, %c0_111] : memref<30x1x128xf32, #tpu.memory_space<vmem>>, vector<1x1x128xf32>
    %122 = vector.shape_cast %121 : vector<1x1x128xf32> to vector<1x128xf32>
    %c6_112 = arith.constant 6 : index
    %c3_113 = arith.constant 3 : index
    %123 = memref.load %arg0[%c6_112, %c3_113] : memref<8x8xi32, #tpu.memory_space<smem>>
    %124 = arith.index_cast %123 : i32 to index
    %c0_114 = arith.constant 0 : index
    %c0_115 = arith.constant 0 : index
    %125 = vector.load %arg1[%124, %c0_114, %c0_115] : memref<30x1x128xf32, #tpu.memory_space<vmem>>, vector<1x1x128xf32>
    %126 = vector.shape_cast %125 : vector<1x1x128xf32> to vector<1x128xf32>
    %c7_116 = arith.constant 7 : index
    %c3_117 = arith.constant 3 : index
    %127 = memref.load %arg0[%c7_116, %c3_117] : memref<8x8xi32, #tpu.memory_space<smem>>
    %128 = arith.index_cast %127 : i32 to index
    %c0_118 = arith.constant 0 : index
    %c0_119 = arith.constant 0 : index
    %129 = vector.load %arg1[%128, %c0_118, %c0_119] : memref<30x1x128xf32, #tpu.memory_space<vmem>>, vector<1x1x128xf32>
    %130 = vector.shape_cast %129 : vector<1x1x128xf32> to vector<1x128xf32>
    %131 = tpu.concatenate %102, %106, %110, %114, %118, %122, %126, %130 in 0 : vector<1x128xf32>, vector<1x128xf32>, vector<1x128xf32>, vector<1x128xf32>, vector<1x128xf32>, vector<1x128xf32>, vector<1x128xf32>, vector<1x128xf32> -> vector<8x128xf32>
    %c0_120 = arith.constant 0 : index
    %c4_121 = arith.constant 4 : index
    %132 = memref.load %arg0[%c0_120, %c4_121] : memref<8x8xi32, #tpu.memory_space<smem>>
    %133 = arith.index_cast %132 : i32 to index
    %c0_122 = arith.constant 0 : index
    %c0_123 = arith.constant 0 : index
    %134 = vector.load %arg1[%133, %c0_122, %c0_123] : memref<30x1x128xf32, #tpu.memory_space<vmem>>, vector<1x1x128xf32>
    %135 = vector.shape_cast %134 : vector<1x1x128xf32> to vector<1x128xf32>
    %c1_124 = arith.constant 1 : index
    %c4_125 = arith.constant 4 : index
    %136 = memref.load %arg0[%c1_124, %c4_125] : memref<8x8xi32, #tpu.memory_space<smem>>
    %137 = arith.index_cast %136 : i32 to index
    %c0_126 = arith.constant 0 : index
    %c0_127 = arith.constant 0 : index
    %138 = vector.load %arg1[%137, %c0_126, %c0_127] : memref<30x1x128xf32, #tpu.memory_space<vmem>>, vector<1x1x128xf32>
    %139 = vector.shape_cast %138 : vector<1x1x128xf32> to vector<1x128xf32>
    %c2_128 = arith.constant 2 : index
    %c4_129 = arith.constant 4 : index
    %140 = memref.load %arg0[%c2_128, %c4_129] : memref<8x8xi32, #tpu.memory_space<smem>>
    %141 = arith.index_cast %140 : i32 to index
    %c0_130 = arith.constant 0 : index
    %c0_131 = arith.constant 0 : index
    %142 = vector.load %arg1[%141, %c0_130, %c0_131] : memref<30x1x128xf32, #tpu.memory_space<vmem>>, vector<1x1x128xf32>
    %143 = vector.shape_cast %142 : vector<1x1x128xf32> to vector<1x128xf32>
    %c3_132 = arith.constant 3 : index
    %c4_133 = arith.constant 4 : index
    %144 = memref.load %arg0[%c3_132, %c4_133] : memref<8x8xi32, #tpu.memory_space<smem>>
    %145 = arith.index_cast %144 : i32 to index
    %c0_134 = arith.constant 0 : index
    %c0_135 = arith.constant 0 : index
    %146 = vector.load %arg1[%145, %c0_134, %c0_135] : memref<30x1x128xf32, #tpu.memory_space<vmem>>, vector<1x1x128xf32>
    %147 = vector.shape_cast %146 : vector<1x1x128xf32> to vector<1x128xf32>
    %c4_136 = arith.constant 4 : index
    %c4_137 = arith.constant 4 : index
    %148 = memref.load %arg0[%c4_136, %c4_137] : memref<8x8xi32, #tpu.memory_space<smem>>
    %149 = arith.index_cast %148 : i32 to index
    %c0_138 = arith.constant 0 : index
    %c0_139 = arith.constant 0 : index
    %150 = vector.load %arg1[%149, %c0_138, %c0_139] : memref<30x1x128xf32, #tpu.memory_space<vmem>>, vector<1x1x128xf32>
    %151 = vector.shape_cast %150 : vector<1x1x128xf32> to vector<1x128xf32>
    %c5_140 = arith.constant 5 : index
    %c4_141 = arith.constant 4 : index
    %152 = memref.load %arg0[%c5_140, %c4_141] : memref<8x8xi32, #tpu.memory_space<smem>>
    %153 = arith.index_cast %152 : i32 to index
    %c0_142 = arith.constant 0 : index
    %c0_143 = arith.constant 0 : index
    %154 = vector.load %arg1[%153, %c0_142, %c0_143] : memref<30x1x128xf32, #tpu.memory_space<vmem>>, vector<1x1x128xf32>
    %155 = vector.shape_cast %154 : vector<1x1x128xf32> to vector<1x128xf32>
    %c6_144 = arith.constant 6 : index
    %c4_145 = arith.constant 4 : index
    %156 = memref.load %arg0[%c6_144, %c4_145] : memref<8x8xi32, #tpu.memory_space<smem>>
    %157 = arith.index_cast %156 : i32 to index
    %c0_146 = arith.constant 0 : index
    %c0_147 = arith.constant 0 : index
    %158 = vector.load %arg1[%157, %c0_146, %c0_147] : memref<30x1x128xf32, #tpu.memory_space<vmem>>, vector<1x1x128xf32>
    %159 = vector.shape_cast %158 : vector<1x1x128xf32> to vector<1x128xf32>
    %c7_148 = arith.constant 7 : index
    %c4_149 = arith.constant 4 : index
    %160 = memref.load %arg0[%c7_148, %c4_149] : memref<8x8xi32, #tpu.memory_space<smem>>
    %161 = arith.index_cast %160 : i32 to index
    %c0_150 = arith.constant 0 : index
    %c0_151 = arith.constant 0 : index
    %162 = vector.load %arg1[%161, %c0_150, %c0_151] : memref<30x1x128xf32, #tpu.memory_space<vmem>>, vector<1x1x128xf32>
    %163 = vector.shape_cast %162 : vector<1x1x128xf32> to vector<1x128xf32>
    %164 = tpu.concatenate %135, %139, %143, %147, %151, %155, %159, %163 in 0 : vector<1x128xf32>, vector<1x128xf32>, vector<1x128xf32>, vector<1x128xf32>, vector<1x128xf32>, vector<1x128xf32>, vector<1x128xf32>, vector<1x128xf32> -> vector<8x128xf32>
    %c0_152 = arith.constant 0 : index
    %c5_153 = arith.constant 5 : index
    %165 = memref.load %arg0[%c0_152, %c5_153] : memref<8x8xi32, #tpu.memory_space<smem>>
    %166 = arith.index_cast %165 : i32 to index
    %c0_154 = arith.constant 0 : index
    %c0_155 = arith.constant 0 : index
    %167 = vector.load %arg1[%166, %c0_154, %c0_155] : memref<30x1x128xf32, #tpu.memory_space<vmem>>, vector<1x1x128xf32>
    %168 = vector.shape_cast %167 : vector<1x1x128xf32> to vector<1x128xf32>
    %c1_156 = arith.constant 1 : index
    %c5_157 = arith.constant 5 : index
    %169 = memref.load %arg0[%c1_156, %c5_157] : memref<8x8xi32, #tpu.memory_space<smem>>
    %170 = arith.index_cast %169 : i32 to index
    %c0_158 = arith.constant 0 : index
    %c0_159 = arith.constant 0 : index
    %171 = vector.load %arg1[%170, %c0_158, %c0_159] : memref<30x1x128xf32, #tpu.memory_space<vmem>>, vector<1x1x128xf32>
    %172 = vector.shape_cast %171 : vector<1x1x128xf32> to vector<1x128xf32>
    %c2_160 = arith.constant 2 : index
    %c5_161 = arith.constant 5 : index
    %173 = memref.load %arg0[%c2_160, %c5_161] : memref<8x8xi32, #tpu.memory_space<smem>>
    %174 = arith.index_cast %173 : i32 to index
    %c0_162 = arith.constant 0 : index
    %c0_163 = arith.constant 0 : index
    %175 = vector.load %arg1[%174, %c0_162, %c0_163] : memref<30x1x128xf32, #tpu.memory_space<vmem>>, vector<1x1x128xf32>
    %176 = vector.shape_cast %175 : vector<1x1x128xf32> to vector<1x128xf32>
    %c3_164 = arith.constant 3 : index
    %c5_165 = arith.constant 5 : index
    %177 = memref.load %arg0[%c3_164, %c5_165] : memref<8x8xi32, #tpu.memory_space<smem>>
    %178 = arith.index_cast %177 : i32 to index
    %c0_166 = arith.constant 0 : index
    %c0_167 = arith.constant 0 : index
    %179 = vector.load %arg1[%178, %c0_166, %c0_167] : memref<30x1x128xf32, #tpu.memory_space<vmem>>, vector<1x1x128xf32>
    %180 = vector.shape_cast %179 : vector<1x1x128xf32> to vector<1x128xf32>
    %c4_168 = arith.constant 4 : index
    %c5_169 = arith.constant 5 : index
    %181 = memref.load %arg0[%c4_168, %c5_169] : memref<8x8xi32, #tpu.memory_space<smem>>
    %182 = arith.index_cast %181 : i32 to index
    %c0_170 = arith.constant 0 : index
    %c0_171 = arith.constant 0 : index
    %183 = vector.load %arg1[%182, %c0_170, %c0_171] : memref<30x1x128xf32, #tpu.memory_space<vmem>>, vector<1x1x128xf32>
    %184 = vector.shape_cast %183 : vector<1x1x128xf32> to vector<1x128xf32>
    %c5_172 = arith.constant 5 : index
    %c5_173 = arith.constant 5 : index
    %185 = memref.load %arg0[%c5_172, %c5_173] : memref<8x8xi32, #tpu.memory_space<smem>>
    %186 = arith.index_cast %185 : i32 to index
    %c0_174 = arith.constant 0 : index
    %c0_175 = arith.constant 0 : index
    %187 = vector.load %arg1[%186, %c0_174, %c0_175] : memref<30x1x128xf32, #tpu.memory_space<vmem>>, vector<1x1x128xf32>
    %188 = vector.shape_cast %187 : vector<1x1x128xf32> to vector<1x128xf32>
    %c6_176 = arith.constant 6 : index
    %c5_177 = arith.constant 5 : index
    %189 = memref.load %arg0[%c6_176, %c5_177] : memref<8x8xi32, #tpu.memory_space<smem>>
    %190 = arith.index_cast %189 : i32 to index
    %c0_178 = arith.constant 0 : index
    %c0_179 = arith.constant 0 : index
    %191 = vector.load %arg1[%190, %c0_178, %c0_179] : memref<30x1x128xf32, #tpu.memory_space<vmem>>, vector<1x1x128xf32>
    %192 = vector.shape_cast %191 : vector<1x1x128xf32> to vector<1x128xf32>
    %c7_180 = arith.constant 7 : index
    %c5_181 = arith.constant 5 : index
    %193 = memref.load %arg0[%c7_180, %c5_181] : memref<8x8xi32, #tpu.memory_space<smem>>
    %194 = arith.index_cast %193 : i32 to index
    %c0_182 = arith.constant 0 : index
    %c0_183 = arith.constant 0 : index
    %195 = vector.load %arg1[%194, %c0_182, %c0_183] : memref<30x1x128xf32, #tpu.memory_space<vmem>>, vector<1x1x128xf32>
    %196 = vector.shape_cast %195 : vector<1x1x128xf32> to vector<1x128xf32>
    %197 = tpu.concatenate %168, %172, %176, %180, %184, %188, %192, %196 in 0 : vector<1x128xf32>, vector<1x128xf32>, vector<1x128xf32>, vector<1x128xf32>, vector<1x128xf32>, vector<1x128xf32>, vector<1x128xf32>, vector<1x128xf32> -> vector<8x128xf32>
    %c0_184 = arith.constant 0 : index
    %c6_185 = arith.constant 6 : index
    %198 = memref.load %arg0[%c0_184, %c6_185] : memref<8x8xi32, #tpu.memory_space<smem>>
    %199 = arith.index_cast %198 : i32 to index
    %c0_186 = arith.constant 0 : index
    %c0_187 = arith.constant 0 : index
    %200 = vector.load %arg1[%199, %c0_186, %c0_187] : memref<30x1x128xf32, #tpu.memory_space<vmem>>, vector<1x1x128xf32>
    %201 = vector.shape_cast %200 : vector<1x1x128xf32> to vector<1x128xf32>
    %c1_188 = arith.constant 1 : index
    %c6_189 = arith.constant 6 : index
    %202 = memref.load %arg0[%c1_188, %c6_189] : memref<8x8xi32, #tpu.memory_space<smem>>
    %203 = arith.index_cast %202 : i32 to index
    %c0_190 = arith.constant 0 : index
    %c0_191 = arith.constant 0 : index
    %204 = vector.load %arg1[%203, %c0_190, %c0_191] : memref<30x1x128xf32, #tpu.memory_space<vmem>>, vector<1x1x128xf32>
    %205 = vector.shape_cast %204 : vector<1x1x128xf32> to vector<1x128xf32>
    %c2_192 = arith.constant 2 : index
    %c6_193 = arith.constant 6 : index
    %206 = memref.load %arg0[%c2_192, %c6_193] : memref<8x8xi32, #tpu.memory_space<smem>>
    %207 = arith.index_cast %206 : i32 to index
    %c0_194 = arith.constant 0 : index
    %c0_195 = arith.constant 0 : index
    %208 = vector.load %arg1[%207, %c0_194, %c0_195] : memref<30x1x128xf32, #tpu.memory_space<vmem>>, vector<1x1x128xf32>
    %209 = vector.shape_cast %208 : vector<1x1x128xf32> to vector<1x128xf32>
    %c3_196 = arith.constant 3 : index
    %c6_197 = arith.constant 6 : index
    %210 = memref.load %arg0[%c3_196, %c6_197] : memref<8x8xi32, #tpu.memory_space<smem>>
    %211 = arith.index_cast %210 : i32 to index
    %c0_198 = arith.constant 0 : index
    %c0_199 = arith.constant 0 : index
    %212 = vector.load %arg1[%211, %c0_198, %c0_199] : memref<30x1x128xf32, #tpu.memory_space<vmem>>, vector<1x1x128xf32>
    %213 = vector.shape_cast %212 : vector<1x1x128xf32> to vector<1x128xf32>
    %c4_200 = arith.constant 4 : index
    %c6_201 = arith.constant 6 : index
    %214 = memref.load %arg0[%c4_200, %c6_201] : memref<8x8xi32, #tpu.memory_space<smem>>
    %215 = arith.index_cast %214 : i32 to index
    %c0_202 = arith.constant 0 : index
    %c0_203 = arith.constant 0 : index
    %216 = vector.load %arg1[%215, %c0_202, %c0_203] : memref<30x1x128xf32, #tpu.memory_space<vmem>>, vector<1x1x128xf32>
    %217 = vector.shape_cast %216 : vector<1x1x128xf32> to vector<1x128xf32>
    %c5_204 = arith.constant 5 : index
    %c6_205 = arith.constant 6 : index
    %218 = memref.load %arg0[%c5_204, %c6_205] : memref<8x8xi32, #tpu.memory_space<smem>>
    %219 = arith.index_cast %218 : i32 to index
    %c0_206 = arith.constant 0 : index
    %c0_207 = arith.constant 0 : index
    %220 = vector.load %arg1[%219, %c0_206, %c0_207] : memref<30x1x128xf32, #tpu.memory_space<vmem>>, vector<1x1x128xf32>
    %221 = vector.shape_cast %220 : vector<1x1x128xf32> to vector<1x128xf32>
    %c6_208 = arith.constant 6 : index
    %c6_209 = arith.constant 6 : index
    %222 = memref.load %arg0[%c6_208, %c6_209] : memref<8x8xi32, #tpu.memory_space<smem>>
    %223 = arith.index_cast %222 : i32 to index
    %c0_210 = arith.constant 0 : index
    %c0_211 = arith.constant 0 : index
    %224 = vector.load %arg1[%223, %c0_210, %c0_211] : memref<30x1x128xf32, #tpu.memory_space<vmem>>, vector<1x1x128xf32>
    %225 = vector.shape_cast %224 : vector<1x1x128xf32> to vector<1x128xf32>
    %c7_212 = arith.constant 7 : index
    %c6_213 = arith.constant 6 : index
    %226 = memref.load %arg0[%c7_212, %c6_213] : memref<8x8xi32, #tpu.memory_space<smem>>
    %227 = arith.index_cast %226 : i32 to index
    %c0_214 = arith.constant 0 : index
    %c0_215 = arith.constant 0 : index
    %228 = vector.load %arg1[%227, %c0_214, %c0_215] : memref<30x1x128xf32, #tpu.memory_space<vmem>>, vector<1x1x128xf32>
    %229 = vector.shape_cast %228 : vector<1x1x128xf32> to vector<1x128xf32>
    %230 = tpu.concatenate %201, %205, %209, %213, %217, %221, %225, %229 in 0 : vector<1x128xf32>, vector<1x128xf32>, vector<1x128xf32>, vector<1x128xf32>, vector<1x128xf32>, vector<1x128xf32>, vector<1x128xf32>, vector<1x128xf32> -> vector<8x128xf32>
    %c0_216 = arith.constant 0 : index
    %c7_217 = arith.constant 7 : index
    %231 = memref.load %arg0[%c0_216, %c7_217] : memref<8x8xi32, #tpu.memory_space<smem>>
    %232 = arith.index_cast %231 : i32 to index
    %c0_218 = arith.constant 0 : index
    %c0_219 = arith.constant 0 : index
    %233 = vector.load %arg1[%232, %c0_218, %c0_219] : memref<30x1x128xf32, #tpu.memory_space<vmem>>, vector<1x1x128xf32>
    %234 = vector.shape_cast %233 : vector<1x1x128xf32> to vector<1x128xf32>
    %c1_220 = arith.constant 1 : index
    %c7_221 = arith.constant 7 : index
    %235 = memref.load %arg0[%c1_220, %c7_221] : memref<8x8xi32, #tpu.memory_space<smem>>
    %236 = arith.index_cast %235 : i32 to index
    %c0_222 = arith.constant 0 : index
    %c0_223 = arith.constant 0 : index
    %237 = vector.load %arg1[%236, %c0_222, %c0_223] : memref<30x1x128xf32, #tpu.memory_space<vmem>>, vector<1x1x128xf32>
    %238 = vector.shape_cast %237 : vector<1x1x128xf32> to vector<1x128xf32>
    %c2_224 = arith.constant 2 : index
    %c7_225 = arith.constant 7 : index
    %239 = memref.load %arg0[%c2_224, %c7_225] : memref<8x8xi32, #tpu.memory_space<smem>>
    %240 = arith.index_cast %239 : i32 to index
    %c0_226 = arith.constant 0 : index
    %c0_227 = arith.constant 0 : index
    %241 = vector.load %arg1[%240, %c0_226, %c0_227] : memref<30x1x128xf32, #tpu.memory_space<vmem>>, vector<1x1x128xf32>
    %242 = vector.shape_cast %241 : vector<1x1x128xf32> to vector<1x128xf32>
    %c3_228 = arith.constant 3 : index
    %c7_229 = arith.constant 7 : index
    %243 = memref.load %arg0[%c3_228, %c7_229] : memref<8x8xi32, #tpu.memory_space<smem>>
    %244 = arith.index_cast %243 : i32 to index
    %c0_230 = arith.constant 0 : index
    %c0_231 = arith.constant 0 : index
    %245 = vector.load %arg1[%244, %c0_230, %c0_231] : memref<30x1x128xf32, #tpu.memory_space<vmem>>, vector<1x1x128xf32>
    %246 = vector.shape_cast %245 : vector<1x1x128xf32> to vector<1x128xf32>
    %c4_232 = arith.constant 4 : index
    %c7_233 = arith.constant 7 : index
    %247 = memref.load %arg0[%c4_232, %c7_233] : memref<8x8xi32, #tpu.memory_space<smem>>
    %248 = arith.index_cast %247 : i32 to index
    %c0_234 = arith.constant 0 : index
    %c0_235 = arith.constant 0 : index
    %249 = vector.load %arg1[%248, %c0_234, %c0_235] : memref<30x1x128xf32, #tpu.memory_space<vmem>>, vector<1x1x128xf32>
    %250 = vector.shape_cast %249 : vector<1x1x128xf32> to vector<1x128xf32>
    %c5_236 = arith.constant 5 : index
    %c7_237 = arith.constant 7 : index
    %251 = memref.load %arg0[%c5_236, %c7_237] : memref<8x8xi32, #tpu.memory_space<smem>>
    %252 = arith.index_cast %251 : i32 to index
    %c0_238 = arith.constant 0 : index
    %c0_239 = arith.constant 0 : index
    %253 = vector.load %arg1[%252, %c0_238, %c0_239] : memref<30x1x128xf32, #tpu.memory_space<vmem>>, vector<1x1x128xf32>
    %254 = vector.shape_cast %253 : vector<1x1x128xf32> to vector<1x128xf32>
    %c6_240 = arith.constant 6 : index
    %c7_241 = arith.constant 7 : index
    %255 = memref.load %arg0[%c6_240, %c7_241] : memref<8x8xi32, #tpu.memory_space<smem>>
    %256 = arith.index_cast %255 : i32 to index
    %c0_242 = arith.constant 0 : index
    %c0_243 = arith.constant 0 : index
    %257 = vector.load %arg1[%256, %c0_242, %c0_243] : memref<30x1x128xf32, #tpu.memory_space<vmem>>, vector<1x1x128xf32>
    %258 = vector.shape_cast %257 : vector<1x1x128xf32> to vector<1x128xf32>
    %c7_244 = arith.constant 7 : index
    %c7_245 = arith.constant 7 : index
    %259 = memref.load %arg0[%c7_244, %c7_245] : memref<8x8xi32, #tpu.memory_space<smem>>
    %260 = arith.index_cast %259 : i32 to index
    %c0_246 = arith.constant 0 : index
    %c0_247 = arith.constant 0 : index
    %261 = vector.load %arg1[%260, %c0_246, %c0_247] : memref<30x1x128xf32, #tpu.memory_space<vmem>>, vector<1x1x128xf32>
    %262 = vector.shape_cast %261 : vector<1x1x128xf32> to vector<1x128xf32>
    %263 = tpu.concatenate %234, %238, %242, %246, %250, %254, %258, %262 in 0 : vector<1x128xf32>, vector<1x128xf32>, vector<1x128xf32>, vector<1x128xf32>, vector<1x128xf32>, vector<1x128xf32>, vector<1x128xf32>, vector<1x128xf32> -> vector<8x128xf32>
    %c0_248 = arith.constant 0 : index
    %c0_249 = arith.constant 0 : index
    %264 = vector.load %arg2[%c0_248, %c0_249] : memref<128x128xbf16, #tpu.memory_space<vmem>>, vector<128x128xbf16>
    %cst = arith.constant 0.000000e+00 : f32
    %265 = vector.broadcast %cst : f32 to vector<8x128xf32>
    %266 = arith.truncf %265 : vector<8x128xf32> to vector<8x128xbf16>
    %cst_250 = arith.constant dense<0.000000e+00> : vector<8x128xf32>
    %267 = tpu.matmul %266, %264, %cst_250 {dimension_numbers = #tpu.dot_dimension_numbers<[1], [0], [0], [1], [0, 0, 1, 1], [], []>} : vector<8x128xbf16>, vector<128x128xbf16>, vector<8x128xf32> -> vector<8x128xf32>
    %268 = arith.addf %32, %267 : vector<8x128xf32>
    %269 = math.tanh %268 : vector<8x128xf32>
    %270 = arith.truncf %269 : vector<8x128xf32> to vector<8x128xbf16>
    %cst_251 = arith.constant dense<0.000000e+00> : vector<8x128xf32>
    %271 = tpu.matmul %270, %264, %cst_251 {dimension_numbers = #tpu.dot_dimension_numbers<[1], [0], [0], [1], [0, 0, 1, 1], [], []>} : vector<8x128xbf16>, vector<128x128xbf16>, vector<8x128xf32> -> vector<8x128xf32>
    %272 = arith.addf %65, %271 : vector<8x128xf32>
    %273 = math.tanh %272 : vector<8x128xf32>
    %274 = arith.truncf %273 : vector<8x128xf32> to vector<8x128xbf16>
    %cst_252 = arith.constant dense<0.000000e+00> : vector<8x128xf32>
    %275 = tpu.matmul %274, %264, %cst_252 {dimension_numbers = #tpu.dot_dimension_numbers<[1], [0], [0], [1], [0, 0, 1, 1], [], []>} : vector<8x128xbf16>, vector<128x128xbf16>, vector<8x128xf32> -> vector<8x128xf32>
    %276 = arith.addf %98, %275 : vector<8x128xf32>
    %277 = math.tanh %276 : vector<8x128xf32>
    %278 = arith.truncf %277 : vector<8x128xf32> to vector<8x128xbf16>
    %cst_253 = arith.constant dense<0.000000e+00> : vector<8x128xf32>
    %279 = tpu.matmul %278, %264, %cst_253 {dimension_numbers = #tpu.dot_dimension_numbers<[1], [0], [0], [1], [0, 0, 1, 1], [], []>} : vector<8x128xbf16>, vector<128x128xbf16>, vector<8x128xf32> -> vector<8x128xf32>
    %280 = arith.addf %131, %279 : vector<8x128xf32>
    %281 = math.tanh %280 : vector<8x128xf32>
    %282 = arith.truncf %281 : vector<8x128xf32> to vector<8x128xbf16>
    %cst_254 = arith.constant dense<0.000000e+00> : vector<8x128xf32>
    %283 = tpu.matmul %282, %264, %cst_254 {dimension_numbers = #tpu.dot_dimension_numbers<[1], [0], [0], [1], [0, 0, 1, 1], [], []>} : vector<8x128xbf16>, vector<128x128xbf16>, vector<8x128xf32> -> vector<8x128xf32>
    %284 = arith.addf %164, %283 : vector<8x128xf32>
    %285 = math.tanh %284 : vector<8x128xf32>
    %286 = arith.truncf %285 : vector<8x128xf32> to vector<8x128xbf16>
    %cst_255 = arith.constant dense<0.000000e+00> : vector<8x128xf32>
    %287 = tpu.matmul %286, %264, %cst_255 {dimension_numbers = #tpu.dot_dimension_numbers<[1], [0], [0], [1], [0, 0, 1, 1], [], []>} : vector<8x128xbf16>, vector<128x128xbf16>, vector<8x128xf32> -> vector<8x128xf32>
    %288 = arith.addf %197, %287 : vector<8x128xf32>
    %289 = math.tanh %288 : vector<8x128xf32>
    %290 = arith.truncf %289 : vector<8x128xf32> to vector<8x128xbf16>
    %cst_256 = arith.constant dense<0.000000e+00> : vector<8x128xf32>
    %291 = tpu.matmul %290, %264, %cst_256 {dimension_numbers = #tpu.dot_dimension_numbers<[1], [0], [0], [1], [0, 0, 1, 1], [], []>} : vector<8x128xbf16>, vector<128x128xbf16>, vector<8x128xf32> -> vector<8x128xf32>
    %292 = arith.addf %230, %291 : vector<8x128xf32>
    %293 = math.tanh %292 : vector<8x128xf32>
    %294 = arith.truncf %293 : vector<8x128xf32> to vector<8x128xbf16>
    %cst_257 = arith.constant dense<0.000000e+00> : vector<8x128xf32>
    %295 = tpu.matmul %294, %264, %cst_257 {dimension_numbers = #tpu.dot_dimension_numbers<[1], [0], [0], [1], [0, 0, 1, 1], [], []>} : vector<8x128xbf16>, vector<128x128xbf16>, vector<8x128xf32> -> vector<8x128xf32>
    %296 = arith.addf %263, %295 : vector<8x128xf32>
    %297 = math.tanh %296 : vector<8x128xf32>
    %298 = arith.truncf %297 : vector<8x128xf32> to vector<8x128xbf16>
    %c0_258 = arith.constant 0 : index
    %c0_259 = arith.constant 0 : index
    %299 = vector.load %arg3[%c0_258, %c0_259] : memref<128x128xbf16, #tpu.memory_space<vmem>>, vector<128x128xbf16>
    %cst_260 = arith.constant dense<0.000000e+00> : vector<8x128xf32>
    %300 = tpu.matmul %298, %299, %cst_260 {dimension_numbers = #tpu.dot_dimension_numbers<[1], [0], [0], [1], [0, 0, 1, 1], [], []>} : vector<8x128xbf16>, vector<128x128xbf16>, vector<8x128xf32> -> vector<8x128xf32>
    %c0_261 = arith.constant 0 : index
    %c0_262 = arith.constant 0 : index
    %301 = vector.load %arg4[%c0_261, %c0_262] : memref<1x128xf32, #tpu.memory_space<vmem>>, vector<1x128xf32>
    %302 = vector.broadcast %301 : vector<1x128xf32> to vector<8x128xf32>
    %303 = arith.addf %300, %302 : vector<8x128xf32>
    %c0_263 = arith.constant 0 : index
    %c0_264 = arith.constant 0 : index
    %304 = vector.load %arg5[%c0_263, %c0_264] : memref<8x128xf32, #tpu.memory_space<vmem>>, vector<8x128xf32>
    tpu.vector_store %arg5[%c0_263, %c0_264], %303 {strides = array<i32>} : memref<8x128xf32, #tpu.memory_space<vmem>>, vector<8x128xf32>,
    return
  }
}

</mosaic_0001>

<bundles_post_ra>
// kernel: rnn_model_forward.1
= control target key start
LH: loop header
LB: loop body
LE: loop exit
PB: predicated region body
PF: predicated region fallthrough
CT: control target
= control target key end

     0   :  { %10 = vsyncpa [#allocation4], 0  ;;  %s2099_s0 = inlined_call_operand.vmem [shape: s32[8,8], index: 0, kind: input, shape index: {}]   ;;  %s2100_s1 = inlined_call_operand.hbm [shape: f32[30,1,128], index: 1, kind: input, shape index: {}]   ;;  %s2101_s2 = inlined_call_operand.hbm [shape: bf16[128,128], index: 2, kind: input, shape index: {}]   ;;  %s2102_s3 = inlined_call_operand.hbm [shape: bf16[128,128], index: 3, kind: input, shape index: {}]   ;;  %s2103_s4 = inlined_call_operand.vmem [shape: f32[1,128], index: 4, kind: input, shape index: {}]   ;;  %s2104_s5 = inlined_call_operand.vmem [shape: f32[8,128], index: 5, kind: output, shape index: {}]  }
   0x1   :  { %11 = vsyncpa [#allocation3], 0 }
   0x2   :  { %12 = vsyncpa [#allocation7], 0  ;;  %s1781_s18 = smov [#allocation6]   ;;  %s19_s22 = sshll.u32 %s2099_s0, 4  ;;  %s20_s22 = int_to_ptr.vmem [resolvable:$true] %s19_s22 }
   0x3   :  { %s40_s19 = sshll.u32 %s1781_s18, 4  ;;  %s1697_s25 = scalar_lea.hbm %s2101_s2, 1024  ;;  %s41_s19 = int_to_ptr.vmem [resolvable:$true] %s40_s19 }
   0x4   :  { %p1698_p0 = scmp.ne.s32.totalorder %s2101_s2, %s1697_s25  ;;  %p1701_p1 = scmp.lt.u32.totalorder %s1697_s25, %s2101_s2 }
   0x6   :  { %p1703_p2 = pnand %p1701_p1, %p1698_p0 }
   0x8   :  { %1706 = shalt.err (!%p1703_p2)
}
   0x9   :  { %s1707_s30 = scalar_lea.vmem %s41_s19, 1024  ;;  %p1712_p4 = scmp.lt.s32.totalorder %s41_s19, %s41_s19 }
   0xa   :  { %p1708_p3 = scmp.ne.s32.totalorder %s41_s19, %s1707_s30  ;;  %p1713_p5 = scmp.lt.s32.totalorder %s1707_s30, %s1707_s30 }
   0xc   :  { %p1714_p6 = por %p1713_p5, %p1712_p4 }
   0xe   :  { %p1715_p7 = pnand %p1714_p6, %p1708_p3 }
  0x10   :  { %1718 = shalt.err (!%p1715_p7)
}
  0x11   :  { %s1782_s0 = smov 64   ;;  %s1783_s6 = smov 4  }
  0x12   :  { %46 = dma.hbm_to_vmem [thread:$0]  %s2101_s2, 1024, %s41_s19, [#allocation7], %s1782_s0, %s1782_s0, %s1783_s6  }
  0x13   :  { %s1719_s9 = scalar_lea.vmem %s20_s22, 128  ;;  %p1724_p9 = scmp.lt.s32.totalorder %s20_s22, %s20_s22 }
  0x14   :  { %p1720_p8 = scmp.ne.s32.totalorder %s20_s22, %s1719_s9  ;;  %p1725_p10 = scmp.lt.s32.totalorder %s1719_s9, %s1719_s9 }
  0x16   :  { %p1726_p11 = por %p1725_p10, %p1724_p9 }
  0x18   :  { %p1727_p12 = pnand %p1726_p11, %p1720_p8 }
  0x1a   :  { %1730 = shalt.err (!%p1727_p12)
}
  0x1b   :  { %s1784_s10 = smov [#allocation2]   ;;  %s1785_s11 = smov [#allocation5]  }
  0x1c   :  { %22 = dma.vmem_to_smem %s20_s22, 128, %s1784_s10, [#allocation4]  }
  0x1d   :  { %s28_s12 = sshll.u32 %s1785_s11, 4  ;;  %s1731_s15 = scalar_lea.hbm %s2100_s1, 480  ;;  %s29_s12 = int_to_ptr.vmem [resolvable:$true] %s28_s12 }
  0x1e   :  { %p1732_p13 = scmp.ne.s32.totalorder %s2100_s1, %s1731_s15  ;;  %p1735_p0 = scmp.lt.u32.totalorder %s1731_s15, %s2100_s1 }
  0x20   :  { %p1737_p1 = pnand %p1735_p0, %p1732_p13 }
  0x22   :  { %1740 = shalt.err (!%p1737_p1)
}
  0x23   :  { %s1741_s19 = scalar_lea.vmem %s29_s12, 480  ;;  %p1746_p3 = scmp.lt.s32.totalorder %s29_s12, %s29_s12 }
  0x24   :  { %p1742_p2 = scmp.ne.s32.totalorder %s29_s12, %s1741_s19  ;;  %p1747_p4 = scmp.lt.s32.totalorder %s1741_s19, %s1741_s19 }
  0x26   :  { %p1748_p5 = por %p1747_p4, %p1746_p3 }
  0x28   :  { %p1749_p6 = pnand %p1748_p5, %p1742_p2 }
  0x2a   :  { %1752 = shalt.err (!%p1749_p6)
}
  0x2b   :  { %s1786_s20 = smov 16   ;;  %s1787_s21 = smov 1  }
  0x2c   :  { %34 = dma.hbm_to_vmem [thread:$0]  %s2100_s1, 480, %s29_s12, [#allocation3], %s1786_s20, %s1786_s20, %s1787_s21  }
  0x2d   :  { %s1788_s24 = smov [#allocation8]   ;;  %s1753_s28 = scalar_lea.hbm %s2102_s3, 1024 }
  0x2e   :  { %s52_s25 = sshll.u32 %s1788_s24, 4  ;;  %p1754_p7 = scmp.ne.s32.totalorder %s2102_s3, %s1753_s28  ;;  %s53_s25 = int_to_ptr.vmem [resolvable:$true] %s52_s25 }
  0x2f   :  { %p1757_p8 = scmp.lt.u32.totalorder %s1753_s28, %s2102_s3 }
  0x31   :  { %p1759_p9 = pnand %p1757_p8, %p1754_p7 }
  0x33   :  { %1762 = shalt.err (!%p1759_p9)
}
  0x34   :  { %s1763_s9 = scalar_lea.vmem %s53_s25, 1024  ;;  %p1768_p11 = scmp.lt.s32.totalorder %s53_s25, %s53_s25 }
  0x35   :  { %p1764_p10 = scmp.ne.s32.totalorder %s53_s25, %s1763_s9  ;;  %p1769_p12 = scmp.lt.s32.totalorder %s1763_s9, %s1763_s9 }
  0x37   :  { %p1770_p13 = por %p1769_p12, %p1768_p11 }
  0x39   :  { %p1771_p0 = pnand %p1770_p13, %p1764_p10 }
  0x3b   :  { %1774 = shalt.err (!%p1771_p0)
}
  0x3c   :  { %58 = dma.hbm_to_vmem [thread:$0]  %s2102_s3, 1024, %s53_s25, [#allocation7], %s1782_s0, %s1782_s0, %s1783_s6  }
  0x3d   :  { %1775 = dma.done.wait [#allocation4], 128  }
  0x3e   :  { %1776 = vsyncadd [#allocation4], 4294967168 }
  0x3f   :  { %1777 = dma.done.wait [#allocation3], 480  }
  0x40   :  { %1778 = vsyncadd [#allocation3], 4294966816 }
  0x41   :  { %1779 = dma.done.wait [#allocation7], 2048  }
  0x42   :  { %1780 = vsyncadd [#allocation7], 4294965248 }
  0x43   :  { %73 = sfence }
  0x44   :  { %v1867_v0 = vld [vmem:[#allocation6] sm:$0xff]   ;;  %v1789_v1 = vmov 0.0   ;;  %v1872_v2 = vld [vmem:[#allocation6 + $0x8] sm:$0xff]   ;;  %vm1790_vm0 = vmmov 0   ;;  %v1882_v3 = vld [vmem:[#allocation6 + $0x10] sm:$0xff]   ;;  %v1791_v9 = vmov 0  }
  0x45   :  { %1474 = vmatprep.subr.bf16.mxu0 %v1789_v1  ;;  %1494 = vmatprep.subr.bf16.mxu1 %v1789_v1  ;;  %v1888_v4 = vld [vmem:[#allocation6 + $0x18] sm:$0xff]   ;;  %v1894_v5 = vld [vmem:[#allocation6 + $0x20] sm:$0xff]   ;;  %v1900_v6 = vld [vmem:[#allocation6 + $0x28] sm:$0xff]   ;;  %s75_s3 = sld [smem:[#allocation2]]  ;;  %vm141_vm1 = vcmask 1040384   ;;  %vm143_vm2 = vcmask 1041408  }
  0x46   :  { %1475 = vmatpush3.bf16.msra.mxu0 %v1867_v0  ;;  %1490 = vmatprep.mubr.msk.bf16.mxu0 %vm1790_vm0, %v1789_v1  ;;  %v1906_v7 = vld [vmem:[#allocation6 + $0x30] sm:$0xff]   ;;  %v1912_v8 = vld [vmem:[#allocation6 + $0x38] sm:$0xff]   ;;  %s1257_s0 = sld [smem:[#allocation2 + $0x80]]  ;;  %vm145_vm3 = vcmask 1042432   ;;  %vm147_vm4 = vcmask 1043456   ;;  %vm149_vm5 = vcmask 1044480  }
  0x47   :  { %1476 = vmatprep.subr.bf16.mxu0 %v1789_v1  ;;  %1495 = vmatpush3.bf16.msra.mxu1 %v1867_v0  ;;  %s1258_s6 = sld [smem:[#allocation2 + $0x100]]  ;;  %vm151_vm6 = vcmask 1045504   ;;  %vm153_vm7 = vcmask 1046528   ;;  %s1271_s23 = sld [smem:[#allocation2 + $0x1]] }
  0x48   :  { %1496 = vmatprep.subr.bf16.mxu1 %v1789_v1  ;;  %1510 = vmatprep.mubr.msk.bf16.mxu1 %vm1790_vm0, %v1789_v1  ;;  %s1259_s11 = sld [smem:[#allocation2 + $0x180]]  ;;  %s1272_s24 = sld [smem:[#allocation2 + $0x81]] }
  0x49   :  { %s1260_s12 = sld [smem:[#allocation2 + $0x200]]  ;;  %s1273_s25 = sld [smem:[#allocation2 + $0x101]] }
  0x4a   :  { %1477 = vmatpush3.bf16.msra.mxu0 %v1872_v2  ;;  %s1261_s15 = sld [smem:[#allocation2 + $0x280]]  ;;  %s1274_s26 = sld [smem:[#allocation2 + $0x181]] }
  0x4b   :  { %1478 = vmatprep.subr.bf16.mxu0 %v1789_v1  ;;  %1497 = vmatpush3.bf16.msra.mxu1 %v1872_v2  ;;  %s76_s13 = scalar_lea.vmem [#allocation5], %s75_s3  ;;  %s1262_s17 = sld [smem:[#allocation2 + $0x300]] }
  0x4c   :  { %1498 = vmatprep.subr.bf16.mxu1 %v1789_v1  ;;  %v77_v10 = vld [vmem:[%s76_s13] sm:$0x1]  ;;  %s79_s14 = scalar_lea.vmem [#allocation5], %s1257_s0  ;;  %s1263_s18 = sld [smem:[#allocation2 + $0x380]] }
  0x4d   :  { %v1264_v11 = vld [vmem:[%s79_s14] ss:$0 sm:$0xff]  ;;  %s82_s16 = scalar_lea.vmem [#allocation5], %s1258_s6  ;;  %s1275_s27 = sld [smem:[#allocation2 + $0x201]] }
  0x4e   :  { %1479 = vmatpush3.bf16.msra.mxu0 %v1882_v3  ;;  %v1265_v12 = vld [vmem:[%s82_s16] ss:$0 sm:$0xff]  ;;  %v142_v13 = vsel %vm141_vm1, %v77_v10, %v1264_v11  ;;  %s85_s2 = scalar_lea.vmem [#allocation5], %s1259_s11  ;;  %s156_s28 = scalar_lea.vmem [#allocation5], %s1271_s23 }
  0x4f   :  { %1480 = vmatprep.subr.bf16.mxu0 %v1789_v1  ;;  %1499 = vmatpush3.bf16.msra.mxu1 %v1882_v3  ;;  %v1266_v14 = vld [vmem:[%s85_s2] ss:$0 sm:$0xff]  ;;  %v144_v15 = vsel %vm143_vm2, %v142_v13, %v1265_v12  ;;  %s88_s19 = scalar_lea.vmem [#allocation5], %s1260_s12  ;;  %s159_s29 = scalar_lea.vmem [#allocation5], %s1272_s24 }
  0x50   :  { %1500 = vmatprep.subr.bf16.mxu1 %v1789_v1  ;;  %v1267_v16 = vld [vmem:[%s88_s19] ss:$0 sm:$0xff]  ;;  %v146_v17 = vsel %vm145_vm3, %v144_v15, %v1266_v14  ;;  %s91_s20 = scalar_lea.vmem [#allocation5], %s1261_s15  ;;  %s1276_s30 = sld [smem:[#allocation2 + $0x281]] }
  0x51   :  { %v1268_v18 = vld [vmem:[%s91_s20] ss:$0 sm:$0xff]  ;;  %v148_v19 = vsel %vm147_vm4, %v146_v17, %v1267_v16  ;;  %s94_s21 = scalar_lea.vmem [#allocation5], %s1262_s17  ;;  %s162_s7 = scalar_lea.vmem [#allocation5], %s1273_s25 }
  0x52   :  { %1481 = vmatpush3.bf16.msra.mxu0 %v1888_v4  ;;  %v1269_v20 = vld [vmem:[%s94_s21] ss:$0 sm:$0xff]  ;;  %v150_v21 = vsel %vm149_vm5, %v148_v19, %v1268_v18  ;;  %s97_s22 = scalar_lea.vmem [#allocation5], %s1263_s18  ;;  %s1277_s8 = sld [smem:[#allocation2 + $0x301]] }
  0x53   :  { %1482 = vmatprep.subr.bf16.mxu0 %v1789_v1  ;;  %1501 = vmatpush3.bf16.msra.mxu1 %v1888_v4  ;;  %v1270_v22 = vld [vmem:[%s97_s22] ss:$0 sm:$0xff]  ;;  %v152_v23 = vsel %vm151_vm6, %v150_v21, %v1269_v20  ;;  %s165_s9 = scalar_lea.vmem [#allocation5], %s1274_s26  ;;  %s1278_s1 = sld [smem:[#allocation2 + $0x381]] }
  0x54   :  { %1502 = vmatprep.subr.bf16.mxu1 %v1789_v1  ;;  %v154_v24 = vsel %vm153_vm7, %v152_v23, %v1270_v22  ;;  %v157_v32 = vld [vmem:[%s156_s28] sm:$0x1]  ;;  %s168_s10 = scalar_lea.vmem [#allocation5], %s1275_s27  ;;  %s1286_s11 = sld [smem:[#allocation2 + $0x2]] }
  0x55   :  { %v1279_v33 = vld [vmem:[%s159_s29] ss:$0 sm:$0xff]  ;;  %s1287_s12 = sld [smem:[#allocation2 + $0x82]]  ;;  %s1301_s26 = sld [smem:[#allocation2 + $0x3]] }
  0x56   :  { %1483 = vmatpush3.bf16.msra.mxu0 %v1894_v5  ;;  %v1280_v34 = vld [vmem:[%s162_s7] ss:$0 sm:$0xff]  ;;  %v221_v35 = vsel %vm141_vm1, %v157_v32, %v1279_v33  ;;  %s171_s3 = scalar_lea.vmem [#allocation5], %s1276_s30  ;;  %s1288_s13 = sld [smem:[#allocation2 + $0x102]] }
  0x57   :  { %1484 = vmatprep.subr.bf16.mxu0 %v1789_v1  ;;  %1503 = vmatpush3.bf16.msra.mxu1 %v1894_v5  ;;  %v1281_v36 = vld [vmem:[%s165_s9] ss:$0 sm:$0xff]  ;;  %v222_v37 = vsel %vm143_vm2, %v221_v35, %v1280_v34  ;;  %s1289_s14 = sld [smem:[#allocation2 + $0x182]]  ;;  %s1302_s27 = sld [smem:[#allocation2 + $0x83]] }
  0x58   :  { %1504 = vmatprep.subr.bf16.mxu1 %v1789_v1  ;;  %v1282_v38 = vld [vmem:[%s168_s10] ss:$0 sm:$0xff]  ;;  %v223_v39 = vsel %vm145_vm3, %v222_v37, %v1281_v36  ;;  %s174_s0 = scalar_lea.vmem [#allocation5], %s1277_s8  ;;  %s1290_s15 = sld [smem:[#allocation2 + $0x202]] }
  0x59   :  { %v1283_v40 = vld [vmem:[%s171_s3] ss:$0 sm:$0xff]  ;;  %v224_v41 = vsel %vm147_vm4, %v223_v39, %v1282_v38  ;;  %s177_s6 = scalar_lea.vmem [#allocation5], %s1278_s1  ;;  %s1291_s2 = sld [smem:[#allocation2 + $0x282]] }
  0x5a   :  { %1485 = vmatpush3.bf16.msra.mxu0 %v1900_v6  ;;  %v1284_v42 = vld [vmem:[%s174_s0] ss:$0 sm:$0xff]  ;;  %v225_v43 = vsel %vm149_vm5, %v224_v41, %v1283_v40  ;;  %s229_s16 = scalar_lea.vmem [#allocation5], %s1286_s11  ;;  %s1292_s19 = sld [smem:[#allocation2 + $0x302]] }
  0x5b   :  { %1486 = vmatprep.subr.bf16.mxu0 %v1789_v1  ;;  %1505 = vmatpush3.bf16.msra.mxu1 %v1900_v6  ;;  %v1285_v44 = vld [vmem:[%s177_s6] ss:$0 sm:$0xff]  ;;  %v226_v45 = vsel %vm151_vm6, %v225_v43, %v1284_v42  ;;  %s232_s17 = scalar_lea.vmem [#allocation5], %s1287_s12  ;;  %s1293_s21 = sld [smem:[#allocation2 + $0x382]] }
  0x5c   :  { %1506 = vmatprep.subr.bf16.mxu1 %v1789_v1  ;;  %v227_v46 = vsel %vm153_vm7, %v226_v45, %v1285_v44  ;;  %v230_v54 = vld [vmem:[%s229_s16] sm:$0x1]  ;;  %s235_s18 = scalar_lea.vmem [#allocation5], %s1288_s13  ;;  %s1303_s28 = sld [smem:[#allocation2 + $0x103]] }
  0x5d   :  { %v1294_v55 = vld [vmem:[%s232_s17] ss:$0 sm:$0xff]  ;;  %s238_s20 = scalar_lea.vmem [#allocation5], %s1289_s14  ;;  %s1304_s29 = sld [smem:[#allocation2 + $0x183]] }
  0x5e   :  { %1487 = vmatpush3.bf16.msra.mxu0 %v1906_v7  ;;  %v1295_v56 = vld [vmem:[%s235_s18] ss:$0 sm:$0xff]  ;;  %v294_v57 = vsel %vm141_vm1, %v230_v54, %v1294_v55  ;;  %s241_s22 = scalar_lea.vmem [#allocation5], %s1290_s15  ;;  %s1305_s30 = sld [smem:[#allocation2 + $0x203]] }
  0x5f   :  { %1488 = vmatprep.subr.bf16.mxu0 %v1789_v1  ;;  %1507 = vmatpush3.bf16.msra.mxu1 %v1906_v7  ;;  %v1296_v58 = vld [vmem:[%s238_s20] ss:$0 sm:$0xff]  ;;  %v295_v59 = vsel %vm143_vm2, %v294_v57, %v1295_v56  ;;  %s244_s23 = scalar_lea.vmem [#allocation5], %s1291_s2  ;;  %s302_s7 = scalar_lea.vmem [#allocation5], %s1301_s26 }
  0x60   :  { %1508 = vmatprep.subr.bf16.mxu1 %v1789_v1  ;;  %v1297_v60 = vld [vmem:[%s241_s22] ss:$0 sm:$0xff]  ;;  %v296_v61 = vsel %vm145_vm3, %v295_v59, %v1296_v58  ;;  %s247_s24 = scalar_lea.vmem [#allocation5], %s1292_s19  ;;  %s305_s8 = scalar_lea.vmem [#allocation5], %s1302_s27 }
  0x61   :  { %v1298_v62 = vld [vmem:[%s244_s23] ss:$0 sm:$0xff]  ;;  %v297_v63 = vsel %vm147_vm4, %v296_v61, %v1297_v60  ;;  %s250_s25 = scalar_lea.vmem [#allocation5], %s1293_s21  ;;  %s1306_s9 = sld [smem:[#allocation2 + $0x283]] }
  0x62   :  { %1489 = vmatpush3.bf16.msra.mxu0 %v1912_v8  ;;  %v298_v10 = vsel %vm149_vm5, %v297_v63, %v1298_v62  ;;  %v1300_v11 = vld [vmem:[%s250_s25] ss:$0 sm:$0xff]  ;;  %s308_s1 = scalar_lea.vmem [#allocation5], %s1303_s28  ;;  %s1307_s10 = sld [smem:[#allocation2 + $0x303]] }
  0x63   :  { %1509 = vmatpush3.bf16.msra.mxu1 %v1912_v8  ;;  %1514 = vmatprep.subr.bf16.mxu0 %v1789_v1  ;;  %v303_v21 = vld [vmem:[%s302_s7] sm:$0x1]  ;;  %s311_s3 = scalar_lea.vmem [#allocation5], %s1304_s29  ;;  %s1308_s0 = sld [smem:[#allocation2 + $0x383]] }
  0x64   :  { %1534 = vmatprep.subr.bf16.mxu1 %v1789_v1  ;;  %v1309_v22 = vld [vmem:[%s305_s8] ss:$0 sm:$0xff]  ;;  %s314_s6 = scalar_lea.vmem [#allocation5], %s1305_s30  ;;  %s1316_s14 = sld [smem:[#allocation2 + $0x4]] }
  0x65   :  { %1491 = vmatmul.mubr.bf16.vlgmr.msra.gmra.mrb[0].mxu0 %v1791_v9  ;;  %v1299_v9 = vld [vmem:[%s247_s24] ss:$0 sm:$0xff]  ;;  %s1317_s15 = sld [smem:[#allocation2 + $0x84]]  ;;  %s1331_s29 = sld [smem:[#allocation2 + $0x5]] }
  0x66   :  { %1515 = vmatpush3.bf16.msra.mxu0 %v1867_v0  ;;  %1530 = vmatprep.mubr.msk.bf16.mxu0 %vm1790_vm0, %v1789_v1  ;;  %v299_v12 = vsel %vm151_vm6, %v298_v10, %v1299_v9  ;;  %v1310_v23 = vld [vmem:[%s308_s1] ss:$0 sm:$0xff]  ;;  %s1318_s16 = sld [smem:[#allocation2 + $0x104]]  ;;  %s1332_s30 = sld [smem:[#allocation2 + $0x85]] }
  0x67   :  { %1516 = vmatprep.subr.bf16.mxu0 %v1789_v1  ;;  %v300_v13 = vsel %vm153_vm7, %v299_v12, %v1300_v11  ;;  %s317_s11 = scalar_lea.vmem [#allocation5], %s1306_s9  ;;  %s1319_s17 = sld [smem:[#allocation2 + $0x184]] }
  0x68   :  { %s320_s12 = scalar_lea.vmem [#allocation5], %s1307_s10  ;;  %s1320_s2 = sld [smem:[#allocation2 + $0x204]] }
  0x69   :  { %s323_s13 = scalar_lea.vmem [#allocation5], %s1308_s0  ;;  %s1321_s20 = sld [smem:[#allocation2 + $0x284]] }
  0x6a   :  { %1517 = vmatpush3.bf16.msra.mxu0 %v1872_v2  ;;  %v1315_v33 = vld [vmem:[%s323_s13] ss:$0 sm:$0xff]  ;;  %s375_s18 = scalar_lea.vmem [#allocation5], %s1316_s14  ;;  %s1322_s22 = sld [smem:[#allocation2 + $0x304]] }
  0x6b   :  { %1518 = vmatprep.subr.bf16.mxu0 %v1789_v1  ;;  %v376_v43 = vld [vmem:[%s375_s18] sm:$0x1]  ;;  %s378_s19 = scalar_lea.vmem [#allocation5], %s1317_s15  ;;  %s1323_s24 = sld [smem:[#allocation2 + $0x384]] }
  0x6c   :  { %v1324_v44 = vld [vmem:[%s378_s19] ss:$0 sm:$0xff]  ;;  %s381_s21 = scalar_lea.vmem [#allocation5], %s1318_s16  ;;  %s1333_s7 = sld [smem:[#allocation2 + $0x105]] }
  0x6d   :  { %v1325_v45 = vld [vmem:[%s381_s21] ss:$0 sm:$0xff]  ;;  %s384_s23 = scalar_lea.vmem [#allocation5], %s1319_s17  ;;  %s1334_s8 = sld [smem:[#allocation2 + $0x185]] }
  0x6e   :  { %1519 = vmatpush3.bf16.msra.mxu0 %v1882_v3  ;;  %s387_s25 = scalar_lea.vmem [#allocation5], %s1320_s2  ;;  %s1335_s9 = sld [smem:[#allocation2 + $0x205]] }
  0x6f   :  { %1520 = vmatprep.subr.bf16.mxu0 %v1789_v1  ;;  %s390_s26 = scalar_lea.vmem [#allocation5], %s1321_s20  ;;  %s448_s1 = scalar_lea.vmem [#allocation5], %s1331_s29 }
  0x70   :  { %s393_s27 = scalar_lea.vmem [#allocation5], %s1322_s22  ;;  %s451_s10 = scalar_lea.vmem [#allocation5], %s1332_s30 }
  0x71   :  { %s396_s28 = scalar_lea.vmem [#allocation5], %s1323_s24  ;;  %s1346_s17 = sld [smem:[#allocation2 + $0x6]] }
  0x72   :  { %1521 = vmatpush3.bf16.msra.mxu0 %v1888_v4  ;;  %v1330_v55 = vld [vmem:[%s396_s28] ss:$0 sm:$0xff]  ;;  %s454_s0 = scalar_lea.vmem [#allocation5], %s1333_s7  ;;  %s1347_s2 = sld [smem:[#allocation2 + $0x86]] }
  0x73   :  { %1522 = vmatprep.subr.bf16.mxu0 %v1789_v1  ;;  %s1348_s18 = sld [smem:[#allocation2 + $0x106]] }
  0x74   :  { %s460_s13 = scalar_lea.vmem [#allocation5], %s1335_s9  ;;  %s1349_s19 = sld [smem:[#allocation2 + $0x186]] }
  0x75   :  { %s1350_s20 = sld [smem:[#allocation2 + $0x206]]  ;;  %s1362_s9 = sld [smem:[#allocation2 + $0x87]] }
  0x76   :  { %1523 = vmatpush3.bf16.msra.mxu0 %v1894_v5 }
  0x77   :  { %1524 = vmatprep.subr.bf16.mxu0 %v1789_v1  ;;  %s521_s21 = scalar_lea.vmem [#allocation5], %s1346_s17 }
  0x78   :  { %s524_s22 = scalar_lea.vmem [#allocation5], %s1347_s2 }
  0x79   :  { %s527_s24 = scalar_lea.vmem [#allocation5], %s1348_s18 }
  0x7a   :  { %1525 = vmatpush3.bf16.msra.mxu0 %v1900_v6 }
  0x7b   :  { %1526 = vmatprep.subr.bf16.mxu0 %v1789_v1  ;;  %s533_s28 = scalar_lea.vmem [#allocation5], %s1350_s20 }
  0x7e   :  { %1527 = vmatpush3.bf16.msra.mxu0 %v1906_v7 }
  0x7f   :  { %1528 = vmatprep.subr.bf16.mxu0 %v1789_v1 }
  0x82   :  { %1529 = vmatpush3.bf16.msra.mxu0 %v1912_v8 }
  0x83   :  { %1554 = vmatprep.subr.bf16.mxu0 %v1789_v1 }
 0x138   :  { %v764_v25 = vpop.f32.mrb[0].mxu0 }
 0x139   :  { %v770_v26 = vadd.f32 %v764_v25, %v154_v24  ;;  %v1492_v27 = vpop.f32.mrb[1].mxu0  ;;  %v367_v24 = vsel %vm141_vm1, %v303_v21, %v1309_v22  ;;  %v1311_v25 = vld [vmem:[%s311_s3] ss:$0 sm:$0xff]  ;;  %s1336_s3 = sld [smem:[#allocation2 + $0x285]] }
 0x13a   :  { %v767_v28 = vpop.f32.mrb[2].mxu0  ;;  %v1312_v27 = vld [vmem:[%s314_s6] ss:$0 sm:$0xff]  ;;  %s1337_s6 = sld [smem:[#allocation2 + $0x305]] }
 0x13b   :  { %1681 = vtanh.f32 %v770_v26  ;;  %v1493_v29 = vpop.f32.mrb[3].mxu0  ;;  %v368_v26 = vsel %vm143_vm2, %v367_v24, %v1310_v23  ;;  %v1673_v24 = vld [vmem:[#allocation8] sm:$0xff]  }
 0x13c   :  { %v369_v28 = vsel %vm145_vm3, %v368_v26, %v1311_v25  ;;  %v1313_v29 = vld [vmem:[%s317_s11] ss:$0 sm:$0xff]  ;;  %s457_s11 = scalar_lea.vmem [#allocation5], %s1334_s8  ;;  %v1674_v25 = vld [vmem:[#allocation8 + $0x8] sm:$0xff]   ;;  %v1675_v26 = vld [vmem:[#allocation8 + $0x10] sm:$0xff]   ;;  %s1361_s8 = sld [smem:[#allocation2 + $0x7]] }
 0x13f   :  { %s463_s14 = scalar_lea.vmem [#allocation5], %s1336_s3  ;;  %s1365_s3 = sld [smem:[#allocation2 + $0x207]] }
 0x140   :  { %v1343_v10 = vld [vmem:[%s463_s14] ss:$0 sm:$0xff]  ;;  %s466_s15 = scalar_lea.vmem [#allocation5], %s1337_s6  ;;  %s597_s6 = scalar_lea.vmem [#allocation5], %s1362_s9 }
 0x141   :  { %v1344_v12 = vld [vmem:[%s466_s15] ss:$0 sm:$0xff]  ;;  %s1368_s15 = sld [smem:[#allocation2 + $0x387]] }
 0x145   :  { %v1682_v30 = vpop.eup %1681 }
 0x146   :  { %v772_v31 = vpack.c.bf16 %v1682_v30, %v1682_v30  ;;  %v370_v30 = vsel %vm147_vm4, %v369_v28, %v1312_v27  ;;  %v1676_v27 = vld [vmem:[#allocation8 + $0x18] sm:$0xff]   ;;  %v522_v28 = vld [vmem:[%s521_s21] sm:$0x1] }
 0x147   :  { %v371_v32 = vsel %vm149_vm5, %v370_v30, %v1313_v29  ;;  %v1354_v29 = vld [vmem:[%s524_s22] ss:$0 sm:$0xff]  ;;  %s615_s18 = scalar_lea.vmem [#allocation5], %s1368_s15 }
 0x148   :  { %1511 = vmatmul.mubr.bf16.vlgmr.msra.gmra.mrb[0].mxu1 %v772_v31  ;;  %v1314_v31 = vld [vmem:[%s320_s12] ss:$0 sm:$0xff]  ;;  %s1338_s12 = sld [smem:[#allocation2 + $0x385]] }
 0x149   :  { %1535 = vmatpush3.bf16.msra.mxu1 %v1867_v0  ;;  %1550 = vmatprep.mubr.msk.bf16.mxu1 %vm1790_vm0, %v1789_v1  ;;  %v372_v34 = vsel %vm151_vm6, %v371_v32, %v1314_v31  ;;  %v1355_v30 = vld [vmem:[%s527_s24] ss:$0 sm:$0xff]  ;;  %v586_v31 = vsel %vm141_vm1, %v522_v28, %v1354_v29 }
 0x14a   :  { %1536 = vmatprep.subr.bf16.mxu1 %v1789_v1  ;;  %v373_v35 = vsel %vm153_vm7, %v372_v34, %v1315_v33  ;;  %v587_v33 = vsel %vm143_vm2, %v586_v31, %v1355_v30  ;;  %v1357_v34 = vld [vmem:[%s533_s28] ss:$0 sm:$0xff] }
 0x14d   :  { %1537 = vmatpush3.bf16.msra.mxu1 %v1872_v2 }
 0x14e   :  { %1538 = vmatprep.subr.bf16.mxu1 %v1789_v1  ;;  %s469_s16 = scalar_lea.vmem [#allocation5], %s1338_s12 }
 0x151   :  { %1539 = vmatpush3.bf16.msra.mxu1 %v1882_v3 }
 0x152   :  { %1540 = vmatprep.subr.bf16.mxu1 %v1789_v1 }
 0x155   :  { %1541 = vmatpush3.bf16.msra.mxu1 %v1888_v4 }
 0x156   :  { %1542 = vmatprep.subr.bf16.mxu1 %v1789_v1 }
 0x159   :  { %1543 = vmatpush3.bf16.msra.mxu1 %v1894_v5 }
 0x15a   :  { %1544 = vmatprep.subr.bf16.mxu1 %v1789_v1 }
 0x15d   :  { %1545 = vmatpush3.bf16.msra.mxu1 %v1900_v6 }
 0x15e   :  { %1546 = vmatprep.subr.bf16.mxu1 %v1789_v1 }
 0x161   :  { %1547 = vmatpush3.bf16.msra.mxu1 %v1906_v7 }
 0x162   :  { %1548 = vmatprep.subr.bf16.mxu1 %v1789_v1 }
 0x165   :  { %1549 = vmatpush3.bf16.msra.mxu1 %v1912_v8 }
 0x166   :  { %1574 = vmatprep.subr.bf16.mxu1 %v1789_v1 }
 0x21b   :  { %v807_v47 = vpop.f32.mrb[0].mxu1 }
 0x21c   :  { %v813_v48 = vadd.f32 %v807_v47, %v227_v46  ;;  %v1512_v49 = vpop.f32.mrb[1].mxu1  ;;  %v440_v46 = vsel %vm141_vm1, %v376_v43, %v1324_v44  ;;  %v1326_v47 = vld [vmem:[%s384_s23] ss:$0 sm:$0xff]  ;;  %s1351_s23 = sld [smem:[#allocation2 + $0x286]] }
 0x21d   :  { %v810_v50 = vpop.f32.mrb[2].mxu1  ;;  %v1327_v49 = vld [vmem:[%s387_s25] ss:$0 sm:$0xff]  ;;  %s1352_s25 = sld [smem:[#allocation2 + $0x306]] }
 0x21e   :  { %1683 = vtanh.f32 %v813_v48  ;;  %v1513_v51 = vpop.f32.mrb[3].mxu1  ;;  %v441_v48 = vsel %vm143_vm2, %v440_v46, %v1325_v45 }
 0x21f   :  { %v442_v50 = vsel %vm145_vm3, %v441_v48, %v1326_v47  ;;  %v1328_v51 = vld [vmem:[%s390_s26] ss:$0 sm:$0xff]  ;;  %s530_s26 = scalar_lea.vmem [#allocation5], %s1349_s19 }
 0x220   :  { %v1356_v32 = vld [vmem:[%s530_s26] ss:$0 sm:$0xff] }
 0x222   :  { %s536_s29 = scalar_lea.vmem [#allocation5], %s1351_s23 }
 0x223   :  { %s539_s30 = scalar_lea.vmem [#allocation5], %s1352_s25 }
 0x228   :  { %v1684_v52 = vpop.eup %1683 }
 0x229   :  { %v815_v53 = vpack.c.bf16 %v1684_v52, %v1684_v52  ;;  %v443_v52 = vsel %vm147_vm4, %v442_v50, %v1327_v49  ;;  %v1677_v50 = vld [vmem:[#allocation8 + $0x20] sm:$0xff]  }
 0x22a   :  { %v444_v54 = vsel %vm149_vm5, %v443_v52, %v1328_v51  ;;  %v1678_v51 = vld [vmem:[#allocation8 + $0x28] sm:$0xff]   ;;  %v1679_v52 = vld [vmem:[#allocation8 + $0x30] sm:$0xff]  }
 0x22b   :  { %1531 = vmatmul.mubr.bf16.vlgmr.msra.gmra.mrb[4].mxu0 %v815_v53  ;;  %v1329_v53 = vld [vmem:[%s393_s27] ss:$0 sm:$0xff]  ;;  %s1353_s27 = sld [smem:[#allocation2 + $0x386]] }
 0x22c   :  { %1555 = vmatpush3.bf16.msra.mxu0 %v1867_v0  ;;  %1570 = vmatprep.mubr.msk.bf16.mxu0 %vm1790_vm0, %v1789_v1  ;;  %v445_v56 = vsel %vm151_vm6, %v444_v54, %v1329_v53  ;;  %v1680_v53 = vld [vmem:[#allocation8 + $0x38] sm:$0xff]  }
 0x22d   :  { %1556 = vmatprep.subr.bf16.mxu0 %v1789_v1  ;;  %v446_v57 = vsel %vm153_vm7, %v445_v56, %v1330_v55  ;;  %v1369_v55 = vld [vmem:[%s597_s6] ss:$0 sm:$0xff] }
 0x230   :  { %1557 = vmatpush3.bf16.msra.mxu0 %v1872_v2 }
 0x231   :  { %1558 = vmatprep.subr.bf16.mxu0 %v1789_v1  ;;  %s542_s7 = scalar_lea.vmem [#allocation5], %s1353_s27 }
 0x234   :  { %1559 = vmatpush3.bf16.msra.mxu0 %v1882_v3 }
 0x235   :  { %1560 = vmatprep.subr.bf16.mxu0 %v1789_v1 }
 0x238   :  { %1561 = vmatpush3.bf16.msra.mxu0 %v1888_v4 }
 0x239   :  { %1562 = vmatprep.subr.bf16.mxu0 %v1789_v1 }
 0x23c   :  { %1563 = vmatpush3.bf16.msra.mxu0 %v1894_v5 }
 0x23d   :  { %1564 = vmatprep.subr.bf16.mxu0 %v1789_v1 }
 0x240   :  { %1565 = vmatpush3.bf16.msra.mxu0 %v1900_v6 }
 0x241   :  { %1566 = vmatprep.subr.bf16.mxu0 %v1789_v1 }
 0x244   :  { %1567 = vmatpush3.bf16.msra.mxu0 %v1906_v7 }
 0x245   :  { %1568 = vmatprep.subr.bf16.mxu0 %v1789_v1 }
 0x248   :  { %1569 = vmatpush3.bf16.msra.mxu0 %v1912_v8 }
 0x249   :  { %1594 = vmatprep.subr.bf16.mxu0 %v1789_v1 }
 0x2fe   :  { %v850_v14 = vpop.f32.mrb[4].mxu0 }
 0x2ff   :  { %v856_v15 = vadd.f32 %v850_v14, %v300_v13  ;;  %v1532_v16 = vpop.f32.mrb[5].mxu0  ;;  %v1345_v14 = vld [vmem:[%s469_s16] ss:$0 sm:$0xff]  ;;  %s606_s16 = scalar_lea.vmem [#allocation5], %s1365_s3 }
 0x300   :  { %v853_v17 = vpop.f32.mrb[6].mxu0 }
 0x301   :  { %1685 = vtanh.f32 %v856_v15  ;;  %v1533_v18 = vpop.f32.mrb[7].mxu0 }
 0x30b   :  { %v1686_v19 = vpop.eup %1685 }
 0x30c   :  { %v858_v20 = vpack.c.bf16 %v1686_v19, %v1686_v19 }
 0x30e   :  { %1551 = vmatmul.mubr.bf16.vlgmr.msra.gmra.mrb[4].mxu1 %v858_v20 }
 0x30f   :  { %1575 = vmatpush3.bf16.msra.mxu1 %v1867_v0  ;;  %1590 = vmatprep.mubr.msk.bf16.mxu1 %vm1790_vm0, %v1789_v1 }
 0x310   :  { %1576 = vmatprep.subr.bf16.mxu1 %v1789_v1 }
 0x313   :  { %1577 = vmatpush3.bf16.msra.mxu1 %v1872_v2 }
 0x314   :  { %1578 = vmatprep.subr.bf16.mxu1 %v1789_v1 }
 0x317   :  { %1579 = vmatpush3.bf16.msra.mxu1 %v1882_v3 }
 0x318   :  { %1580 = vmatprep.subr.bf16.mxu1 %v1789_v1 }
 0x31b   :  { %1581 = vmatpush3.bf16.msra.mxu1 %v1888_v4 }
 0x31c   :  { %1582 = vmatprep.subr.bf16.mxu1 %v1789_v1 }
 0x31f   :  { %1583 = vmatpush3.bf16.msra.mxu1 %v1894_v5 }
 0x320   :  { %1584 = vmatprep.subr.bf16.mxu1 %v1789_v1 }
 0x323   :  { %1585 = vmatpush3.bf16.msra.mxu1 %v1900_v6 }
 0x324   :  { %1586 = vmatprep.subr.bf16.mxu1 %v1789_v1 }
 0x327   :  { %1587 = vmatpush3.bf16.msra.mxu1 %v1906_v7 }
 0x328   :  { %1588 = vmatprep.subr.bf16.mxu1 %v1789_v1 }
 0x32b   :  { %1589 = vmatpush3.bf16.msra.mxu1 %v1912_v8 }
 0x32c   :  { %1614 = vmatprep.subr.bf16.mxu1 %v1789_v1 }
 0x3e1   :  { %v893_v36 = vpop.f32.mrb[4].mxu1 }
 0x3e2   :  { %v899_v37 = vadd.f32 %v893_v36, %v373_v35  ;;  %v1552_v38 = vpop.f32.mrb[5].mxu1  ;;  %v588_v35 = vsel %vm145_vm3, %v587_v33, %v1356_v32  ;;  %v1358_v36 = vld [vmem:[%s536_s29] ss:$0 sm:$0xff] }
 0x3e3   :  { %v896_v39 = vpop.f32.mrb[6].mxu1  ;;  %v1359_v38 = vld [vmem:[%s539_s30] ss:$0 sm:$0xff] }
 0x3e4   :  { %1687 = vtanh.f32 %v899_v37  ;;  %v1553_v40 = vpop.f32.mrb[7].mxu1  ;;  %v589_v37 = vsel %vm147_vm4, %v588_v35, %v1357_v34 }
 0x3e5   :  { %v590_v39 = vsel %vm149_vm5, %v589_v37, %v1358_v36  ;;  %v1360_v40 = vld [vmem:[%s542_s7] ss:$0 sm:$0xff] }
 0x3ee   :  { %v1688_v41 = vpop.eup %1687 }
 0x3ef   :  { %v901_v42 = vpack.c.bf16 %v1688_v41, %v1688_v41  ;;  %v591_v41 = vsel %vm151_vm6, %v590_v39, %v1359_v38 }
 0x3f1   :  { %1571 = vmatmul.mubr.bf16.vlgmr.msra.gmra.mrb[8].mxu0 %v901_v42  ;;  %v592_v42 = vsel %vm153_vm7, %v591_v41, %v1360_v40 }
 0x3f2   :  { %1595 = vmatpush3.bf16.msra.mxu0 %v1867_v0  ;;  %1610 = vmatprep.mubr.msk.bf16.mxu0 %vm1790_vm0, %v1789_v1 }
 0x3f3   :  { %1596 = vmatprep.subr.bf16.mxu0 %v1789_v1 }
 0x3f6   :  { %1597 = vmatpush3.bf16.msra.mxu0 %v1872_v2 }
 0x3f7   :  { %1598 = vmatprep.subr.bf16.mxu0 %v1789_v1 }
 0x3fa   :  { %1599 = vmatpush3.bf16.msra.mxu0 %v1882_v3 }
 0x3fb   :  { %1600 = vmatprep.subr.bf16.mxu0 %v1789_v1 }
 0x3fe   :  { %1601 = vmatpush3.bf16.msra.mxu0 %v1888_v4 }
 0x3ff   :  { %1602 = vmatprep.subr.bf16.mxu0 %v1789_v1 }
 0x402   :  { %1603 = vmatpush3.bf16.msra.mxu0 %v1894_v5 }
 0x403   :  { %1604 = vmatprep.subr.bf16.mxu0 %v1789_v1 }
 0x406   :  { %1605 = vmatpush3.bf16.msra.mxu0 %v1900_v6 }
 0x407   :  { %1606 = vmatprep.subr.bf16.mxu0 %v1789_v1 }
 0x40a   :  { %1607 = vmatpush3.bf16.msra.mxu0 %v1906_v7 }
 0x40b   :  { %1608 = vmatprep.subr.bf16.mxu0 %v1789_v1 }
 0x40e   :  { %1609 = vmatpush3.bf16.msra.mxu0 %v1912_v8 }
 0x40f   :  { %1634 = vmatprep.subr.bf16.mxu0 %v1789_v1 }
 0x4c4   :  { %v936_v58 = vpop.f32.mrb[8].mxu0 }
 0x4c5   :  { %v942_v59 = vadd.f32 %v936_v58, %v446_v57  ;;  %v1572_v60 = vpop.f32.mrb[9].mxu0 }
 0x4c6   :  { %v939_v61 = vpop.f32.mrb[10].mxu0 }
 0x4c7   :  { %1689 = vtanh.f32 %v942_v59  ;;  %v1573_v62 = vpop.f32.mrb[11].mxu0  ;;  %v1372_v59 = vld [vmem:[%s606_s16] ss:$0 sm:$0xff] }
 0x4d1   :  { %v1690_v63 = vpop.eup %1689 }
 0x4d2   :  { %v944_v9 = vpack.c.bf16 %v1690_v63, %v1690_v63 }
 0x4d4   :  { %1591 = vmatmul.mubr.bf16.vlgmr.msra.gmra.mrb[8].mxu1 %v944_v9 }
 0x4d5   :  { %1615 = vmatpush3.bf16.msra.mxu1 %v1867_v0  ;;  %1630 = vmatprep.mubr.msk.bf16.mxu1 %vm1790_vm0, %v1789_v1  ;;  %v449_v0 = vld [vmem:[%s448_s1] sm:$0x1]  ;;  %s1363_s1 = sld [smem:[#allocation2 + $0x107]] }
 0x4d6   :  { %1616 = vmatprep.subr.bf16.mxu1 %v1789_v1 }
 0x4d9   :  { %1617 = vmatpush3.bf16.msra.mxu1 %v1872_v2  ;;  %v1339_v2 = vld [vmem:[%s451_s10] ss:$0 sm:$0xff]  ;;  %s1364_s10 = sld [smem:[#allocation2 + $0x187]] }
 0x4da   :  { %1618 = vmatprep.subr.bf16.mxu1 %v1789_v1 }
 0x4db   :  { %s600_s12 = scalar_lea.vmem [#allocation5], %s1363_s1 }
 0x4dc   :  { %v1370_v56 = vld [vmem:[%s600_s12] ss:$0 sm:$0xff] }
 0x4dd   :  { %1619 = vmatpush3.bf16.msra.mxu1 %v1882_v3  ;;  %v1340_v3 = vld [vmem:[%s454_s0] ss:$0 sm:$0xff]  ;;  %s594_s0 = scalar_lea.vmem [#allocation5], %s1361_s8 }
 0x4de   :  { %1620 = vmatprep.subr.bf16.mxu1 %v1789_v1  ;;  %v595_v54 = vld [vmem:[%s594_s0] sm:$0x1] }
 0x4df   :  { %v659_v57 = vsel %vm141_vm1, %v595_v54, %v1369_v55  ;;  %s603_s14 = scalar_lea.vmem [#allocation5], %s1364_s10 }
 0x4e0   :  { %v1371_v58 = vld [vmem:[%s603_s14] ss:$0 sm:$0xff] }
 0x4e1   :  { %1621 = vmatpush3.bf16.msra.mxu1 %v1888_v4  ;;  %v513_v4 = vsel %vm141_vm1, %v449_v0, %v1339_v2  ;;  %v1375_v0 = vld [vmem:[%s615_s18] ss:$0 sm:$0xff] }
 0x4e2   :  { %1622 = vmatprep.subr.bf16.mxu1 %v1789_v1 }
 0x4e5   :  { %1623 = vmatpush3.bf16.msra.mxu1 %v1894_v5  ;;  %v1341_v5 = vld [vmem:[%s457_s11] ss:$0 sm:$0xff]  ;;  %s1366_s11 = sld [smem:[#allocation2 + $0x287]] }
 0x4e6   :  { %1624 = vmatprep.subr.bf16.mxu1 %v1789_v1 }
 0x4e9   :  { %1625 = vmatpush3.bf16.msra.mxu1 %v1900_v6  ;;  %v514_v6 = vsel %vm143_vm2, %v513_v4, %v1340_v3 }
 0x4ea   :  { %1626 = vmatprep.subr.bf16.mxu1 %v1789_v1 }
 0x4eb   :  { %s609_s17 = scalar_lea.vmem [#allocation5], %s1366_s11 }
 0x4ec   :  { %v1373_v61 = vld [vmem:[%s609_s17] ss:$0 sm:$0xff] }
 0x4ed   :  { %1627 = vmatpush3.bf16.msra.mxu1 %v1906_v7  ;;  %v1342_v7 = vld [vmem:[%s460_s13] ss:$0 sm:$0xff]  ;;  %s1367_s13 = sld [smem:[#allocation2 + $0x307]] }
 0x4ee   :  { %1628 = vmatprep.subr.bf16.mxu1 %v1789_v1 }
 0x4f1   :  { %1629 = vmatpush3.bf16.msra.mxu1 %v1912_v8  ;;  %v515_v8 = vsel %vm145_vm3, %v514_v6, %v1341_v5 }
 0x4f2   :  { %v516_v11 = vsel %vm147_vm4, %v515_v8, %v1342_v7 }
 0x4f3   :  { %v517_v13 = vsel %vm149_vm5, %v516_v11, %v1343_v10  ;;  %s612_s2 = scalar_lea.vmem [#allocation5], %s1367_s13 }
 0x4f4   :  { %v518_v15 = vsel %vm151_vm6, %v517_v13, %v1344_v12  ;;  %v1374_v63 = vld [vmem:[%s612_s2] ss:$0 sm:$0xff] }
 0x4f5   :  { %v519_v16 = vsel %vm153_vm7, %v518_v15, %v1345_v14  ;;  %v1384_v12 = vld [vmem:[%s2103_s4] ss:$0 sm:$0xff] }
 0x5a7   :  { %v979_v17 = vpop.f32.mrb[8].mxu1 }
 0x5a8   :  { %v985_v18 = vadd.f32 %v979_v17, %v519_v16  ;;  %v1592_v19 = vpop.f32.mrb[9].mxu1 }
 0x5a9   :  { %v982_v20 = vpop.f32.mrb[10].mxu1 }
 0x5aa   :  { %1691 = vtanh.f32 %v985_v18  ;;  %v1593_v21 = vpop.f32.mrb[11].mxu1 }
 0x5b4   :  { %v1692_v22 = vpop.eup %1691 }
 0x5b5   :  { %v987_v23 = vpack.c.bf16 %v1692_v22, %v1692_v22 }
 0x5b7   :  { %1611 = vmatmul.mubr.bf16.vlgmr.msra.gmra.mrb[12].mxu0 %v987_v23 }
 0x5b8   :  { %1650 = vmatprep.mubr.msk.bf16.mxu0 %vm1790_vm0, %v1789_v1  ;;  %1635 = vmatpush3.bf16.msra.mxu0 %v1673_v24 }
 0x5b9   :  { %1636 = vmatprep.subr.bf16.mxu0 %v1789_v1 }
 0x5bc   :  { %1637 = vmatpush3.bf16.msra.mxu0 %v1674_v25 }
 0x5bd   :  { %1638 = vmatprep.subr.bf16.mxu0 %v1789_v1 }
 0x5c0   :  { %1639 = vmatpush3.bf16.msra.mxu0 %v1675_v26 }
 0x5c1   :  { %1640 = vmatprep.subr.bf16.mxu0 %v1789_v1 }
 0x5c4   :  { %1641 = vmatpush3.bf16.msra.mxu0 %v1676_v27 }
 0x5c5   :  { %1642 = vmatprep.subr.bf16.mxu0 %v1789_v1 }
 0x5c8   :  { %1643 = vmatpush3.bf16.msra.mxu0 %v1677_v50 }
 0x5c9   :  { %1644 = vmatprep.subr.bf16.mxu0 %v1789_v1 }
 0x5cc   :  { %1645 = vmatpush3.bf16.msra.mxu0 %v1678_v51 }
 0x5cd   :  { %1646 = vmatprep.subr.bf16.mxu0 %v1789_v1 }
 0x5d0   :  { %1647 = vmatpush3.bf16.msra.mxu0 %v1679_v52 }
 0x5d1   :  { %1648 = vmatprep.subr.bf16.mxu0 %v1789_v1  ;;  %v660_v1 = vsel %vm143_vm2, %v659_v57, %v1370_v56 }
 0x5d2   :  { %v661_v60 = vsel %vm145_vm3, %v660_v1, %v1371_v58 }
 0x5d3   :  { %v662_v62 = vsel %vm147_vm4, %v661_v60, %v1372_v59 }
 0x5d4   :  { %1649 = vmatpush3.bf16.msra.mxu0 %v1680_v53  ;;  %v663_v9 = vsel %vm149_vm5, %v662_v62, %v1373_v61 }
 0x5d5   :  { %v664_v2 = vsel %vm151_vm6, %v663_v9, %v1374_v63 }
 0x5d6   :  { %v665_v3 = vsel %vm153_vm7, %v664_v2, %v1375_v0 }
 0x68a   :  { %v1022_v43 = vpop.f32.mrb[12].mxu0 }
 0x68b   :  { %v1028_v44 = vadd.f32 %v1022_v43, %v592_v42  ;;  %v1612_v45 = vpop.f32.mrb[13].mxu0 }
 0x68c   :  { %v1025_v46 = vpop.f32.mrb[14].mxu0 }
 0x68d   :  { %1693 = vtanh.f32 %v1028_v44  ;;  %v1613_v47 = vpop.f32.mrb[15].mxu0 }
 0x697   :  { %v1694_v48 = vpop.eup %1693 }
 0x698   :  { %v1030_v49 = vpack.c.bf16 %v1694_v48, %v1694_v48 }
 0x69a   :  { %1631 = vmatmul.mubr.bf16.vlgmr.msra.gmra.mrb[12].mxu1 %v1030_v49 }
 0x76d   :  { %v1065_v4 = vpop.f32.mrb[12].mxu1 }
 0x76e   :  { %v1071_v5 = vadd.f32 %v1065_v4, %v665_v3  ;;  %v1632_v6 = vpop.f32.mrb[13].mxu1 }
 0x76f   :  { %v1068_v7 = vpop.f32.mrb[14].mxu1 }
 0x770   :  { %1695 = vtanh.f32 %v1071_v5  ;;  %v1633_v8 = vpop.f32.mrb[15].mxu1 }
 0x77a   :  { %v1696_v10 = vpop.eup %1695 }
 0x77b   :  { %v1073_v11 = vpack.c.bf16 %v1696_v10, %v1696_v10 }
 0x77d   :  { %1651 = vmatmul.mubr.bf16.vlgmr.msra.gmra.mrb[16].mxu0 %v1073_v11 }
 0x850   :  { %v1179_v13 = vpop.f32.mrb[16].mxu0 }
 0x851   :  { %v1180_v14 = vadd.f32 %v1384_v12, %v1179_v13  ;;  %v1652_v15 = vpop.f32.mrb[17].mxu0 }
 0x852   :  { %v1182_v16 = vpop.f32.mrb[18].mxu0 }
 0x853   :  { %1185 = vst [vmem:[%s2104_s5] sm:$0xff] %v1180_v14  ;;  %v1653_v17 = vpop.f32.mrb[19].mxu0 }
 0x854   :  { %1190 = vsyncpa [#allocation3], 1 }
 0x855   :  { %1191 = vsyncpa [#allocation7], 1 }
 0x856   :  { %1192 = vsyncpa [#allocation4], 1 }

</bundles_post_ra>
